<compile_context>
chip_gen: v7x
topology: tpu7x:2x2x1
jax: 0.10.0
libtpu: 0.0.40
codegen_flags: <defaults>
</compile_context>

<pallas_src>
import functools

import jax
import jax.numpy as jnp
from jax.experimental import pallas as pl
from jax.experimental.pallas import tpu as pltpu


def _attn_kernel(x_ref, wt_ref, b_ref, wsum_ref, bsum_ref, o_ref, *,
                 emb_dim, seq_len, batch_tile, mxu_dtype):
    E, S, Bt = emb_dim, seq_len, batch_tile
    inv_e = jnp.float32(1.0 / E)

    # ---- qkv projection: one (Bt*S, E) x (E, 3E) GEMM.  x / W^T arrive already
    # in the MXU operand dtype (bf16 by default); accumulate + bias add in f32.
    x2d = x_ref[...].reshape(Bt * S, E)
    k1_f32 = (jnp.dot(x2d, wt_ref[...], preferred_element_type=jnp.float32)
              + b_ref[...])                                    # (Bt*S, 3E) f32
    k1_f32 = k1_f32.reshape(Bt, S, 3 * E)
    # Single cast of k1 for every MXU consumer (q1 and [k2 | v1] are views).
    k1m = k1_f32.astype(mxu_dtype)

    q1 = k1m[:, :, :E]                # (Bt, S, E)
    kv = k1m[:, :, E:]                # (Bt, S, 2E)  == [k2 | v1]

    # query[b,h,j] = sum_i q1[b,i,h]*k2[b,i,j]; key[b,j,c] = sum_i q1[b,i,j]*v1[b,i,c]
    # Both contract q1 over its sequence dim -> one transpose (folded into the
    # MXU operand path by Mosaic) and a single fused batched matmul vs [k2|v1].
    q1t = jnp.swapaxes(q1, 1, 2)                               # (Bt, E, S)
    qk = jnp.einsum('bhi,bix->bhx', q1t, kv,
                    preferred_element_type=jnp.float32)        # (Bt, E, 2E) f32
    qkm = qk.astype(mxu_dtype)                                 # one cast, two views
    query = qkm[:, :, :E]                                      # (Bt, E, E)
    key = qkm[:, :, E:]                                        # (Bt, E, E)

    # scores = query @ key^T / E   (the zeros attn_mask add is a no-op)
    scores = jnp.einsum('bhj,bkj->bhk', query, key,
                        preferred_element_type=jnp.float32) * inv_e   # (Bt,E,E)

    # Numerically-stable softmax over the last dim (f32 VPU math; recip on EUP).
    m = jnp.max(scores, axis=-1, keepdims=True)
    e = jnp.exp(scores - m)
    attn = e * pl.reciprocal(jnp.sum(e, axis=-1, keepdims=True), approx=True)
    # TODO(synk): train-mode Dropout(0.2) not implemented (eval => identity);
    # would use pltpu.prng_seed / pltpu.stateful_bernoulli here.

    # ---- Tail, fully reassociated (exact algebraic identities):
    #   x3 = x2[...,0] + x2[...,E] + x2[...,2E]
    #      = (attn @ v1) @ (w[0]+w[E]+w[2E]) + (b[0]+b[E]+b[2E])
    #      = attn @ (v1 @ w_sum) + b_sum
    # No attn@v1 E^3 matmul, no (Bt,E,E) x1 intermediate, no second qkv GEMM.
    v1_f32 = k1_f32[:, :, 2 * E:]                              # (Bt, S, E) f32
    wsum = wsum_ref[...][None, :, :]                           # (1, 1, E)
    v1w = jnp.sum(v1_f32 * wsum, axis=-1)                      # (Bt, S) == (Bt, E)
    o = jnp.sum(attn * v1w[:, None, :], axis=-1) + bsum_ref[0, 0]   # (Bt, E)
    o_ref[...] = o.astype(o_ref.dtype)


def model_forward(x, w, b, *, emb_dim, batch_tile=32, mxu_dtype=jnp.bfloat16):
    """x: (B, S, E) f32, w: (3E, E) f32, b: (3E,) f32  ->  (B, E) f32.

    MXU operands run in bf16 by default (native MXU format on v5e/v6e/v7x);
    accumulation and softmax/epilogue math are f32.  Pass mxu_dtype=jnp.float32
    for bit-tighter numerics at reduced MXU throughput.
    """
    B, S, E = x.shape
    assert E == emb_dim and S == E, "this forward requires S == emb_dim"
    Bt = min(batch_tile, B)
    assert B % Bt == 0, "B must be divisible by batch_tile"

    # Pre-cast in the wrapper: halves x / W^T HBM bytes and removes per-grid-step
    # VPU casts of the (resident) weight.
    xm = x.astype(mxu_dtype)
    wt = jnp.transpose(w).astype(mxu_dtype)                    # (E, 3E), lane-dense
    b2 = b.reshape(1, 3 * E).astype(jnp.float32)
    # Folded second-pass parameters (exact algebraic identity).
    w_sum = (w[0] + w[E] + w[2 * E]).reshape(1, E).astype(jnp.float32)
    b_sum = (b[0] + b[E] + b[2 * E]).reshape(1, 1).astype(jnp.float32)

    kernel = functools.partial(_attn_kernel, emb_dim=E, seq_len=S,
                               batch_tile=Bt, mxu_dtype=mxu_dtype)

    bytes_in = (xm.size * xm.dtype.itemsize + wt.size * wt.dtype.itemsize
                + b2.size * 4 + w_sum.size * 4 + b_sum.size * 4)
    cost = pl.CostEstimate(
        flops=int(2 * B * (S * E * 3 * E        # qkv GEMM
                           + E * S * 2 * E      # fused q1^T @ [k2|v1]
                           + E * E * E)         # query @ key^T
                  + 3 * B * S * E),             # reassociated tail reductions
        transcendentals=int(B * E * E),         # softmax exp
        bytes_accessed=int(bytes_in + B * E * 4),
    )

    return pl.pallas_call(
        kernel,
        out_shape=jax.ShapeDtypeStruct((B, E), jnp.float32),
        grid_spec=pltpu.PrefetchScalarGridSpec(
            num_scalar_prefetch=0,
            grid=(B // Bt,),
            in_specs=[
                pl.BlockSpec((Bt, S, E), lambda i: (i, 0, 0)),   # batch block of x
                pl.BlockSpec((E, 3 * E), lambda i: (0, 0)),      # full W^T (resident)
                pl.BlockSpec((1, 3 * E), lambda i: (0, 0)),      # bias row
                pl.BlockSpec((1, E), lambda i: (0, 0)),          # folded weight row
                pl.BlockSpec(memory_space=pltpu.MemorySpace.SMEM),  # folded bias scalar
            ],
            out_specs=pl.BlockSpec((Bt, E), lambda i: (i, 0)),   # (Bt, E) row block
        ),
        compiler_params=pltpu.CompilerParams(
            dimension_semantics=("parallel",)),
        cost_estimate=cost,
    )(xm, wt, b2, w_sum, b_sum)


def _reference(x, w, b, *, emb_dim):
    """Pure-JAX f32 reference of the same (repaired) forward semantics."""
    E = emb_dim
    k1 = jnp.einsum("bse,oe->bso", x, w) + b                   # (B,S,3E)
    q1, k2, v1 = k1[..., :E], k1[..., E:2 * E], k1[..., 2 * E:]
    query = jnp.einsum("bih,bij->bhj", q1, k2)                  # (B,E,E)
    key = jnp.einsum("bij,bic->bjc", q1, v1)                    # (B,E,E)
    scores = jnp.einsum("bhj,bkj->bhk", query, key) / float(E)
    attn = jax.nn.softmax(scores, axis=-1)
    x1 = jnp.einsum("bij,bjk->bik", attn, v1)                   # (B,E,E)
    x2 = jnp.einsum("bie,oe->bio", x1, w) + b                   # (B,E,3E)
    return x2[..., 0] + x2[..., E] + x2[..., 2 * E]             # (B,E)


if __name__ == "__main__":
    B = 128          # batches: Bt=32 per grid step -> grid length 4 (pipelines)
    EMB = 8          # emb_dim (generalized from the degenerate emb_dim=1)
    S = EMB          # sequence length must equal emb_dim (see note above)

    key = jax.random.PRNGKey(0)
    kx, kw, kb = jax.random.split(key, 3)

    x = jax.random.uniform(kx, (B, S, EMB), dtype=jnp.float32)
    # Deterministic Linear(EMB, 3*EMB) parameters (PyTorch-style uniform init).
    bound = 1.0 / (EMB ** 0.5)
    w = jax.random.uniform(kw, (3 * EMB, EMB), dtype=jnp.float32,
                           minval=-bound, maxval=bound)
    b = jax.random.uniform(kb, (3 * EMB,), dtype=jnp.float32,
                           minval=-bound, maxval=bound)

    ref = _reference(x, w, b, emb_dim=EMB)
    scale = float(jnp.maximum(jnp.max(jnp.abs(ref)), 1.0))

    # Tight check with f32 MXU operands: validates the reassociated algebra;
    # the only approximation left is the EUP approx-reciprocal in the softmax.
    out_f32 = jax.block_until_ready(
        model_forward(x, w, b, emb_dim=EMB, batch_tile=32,
                      mxu_dtype=jnp.float32))
    assert out_f32.shape == (B, EMB)
    assert float(jnp.max(jnp.abs(out_f32 - ref))) <= 5e-3 * scale, \
        "f32-MXU kernel mismatch vs reference"

    # Default (performance) path: bf16 MXU operands, f32 accumulation.
    out = jax.block_until_ready(
        model_forward(x, w, b, emb_dim=EMB, batch_tile=32))
    out = jax.block_until_ready(out)
    assert out.shape == (B, EMB)
    # Tolerance covers bf16 operand rounding through three MXU stages plus the
    # approx reciprocal (observed error is ~1e-2 of scale, bound set at 6e-2).
    assert float(jnp.max(jnp.abs(out - ref))) <= 6e-2 * scale, \
        "bf16-MXU kernel mismatch vs reference"

    print("KERNEL_OK")
</pallas_src>

<mosaic_0001>
module attributes {stable_mosaic.version = 11 : i64} {
  func.func @_attn_kernel(%arg0: i32, %arg1: memref<32x8x8xf32, #tpu.memory_space<vmem>>, %arg2: memref<8x24xf32, #tpu.memory_space<vmem>>, %arg3: memref<1x24xf32, #tpu.memory_space<vmem>>, %arg4: memref<1x8xf32, #tpu.memory_space<vmem>>, %arg5: memref<1x1xf32, #tpu.memory_space<smem>>, %arg6: memref<32x8xf32, #tpu.memory_space<vmem>>) attributes {dimension_semantics = [#tpu.dimension_semantics<parallel>], iteration_bounds = array<i64: 4>, scalar_prefetch = 0 : i64, scratch_operands = 0 : i64, tpu.core_type = #tpu.core_type<tc>, window_params = [{transform_indices = @transform_0, window_bounds = array<i64: 32, 8, 8>}, {pipeline_mode = #tpu.pipeline_mode<synchronous>, transform_indices = @transform_1, window_bounds = array<i64: 8, 24>}, {pipeline_mode = #tpu.pipeline_mode<synchronous>, transform_indices = @transform_2, window_bounds = array<i64: 1, 24>}, {pipeline_mode = #tpu.pipeline_mode<synchronous>, transform_indices = @transform_3, window_bounds = array<i64: 1, 8>}, {transform_indices = @transform_4, window_bounds = array<i64: 1, 1>}, {transform_indices = @transform_5, window_bounds = array<i64: 32, 8>}]} {
    %c0 = arith.constant 0 : index
    %c0_0 = arith.constant 0 : index
    %c0_1 = arith.constant 0 : index
    %0 = vector.load %arg1[%c0, %c0_0, %c0_1] : memref<32x8x8xf32, #tpu.memory_space<vmem>>, vector<32x8x8xf32>
    %1 = vector.shape_cast %0 : vector<32x8x8xf32> to vector<256x8xf32>
    %c0_2 = arith.constant 0 : index
    %c0_3 = arith.constant 0 : index
    %2 = vector.load %arg2[%c0_2, %c0_3] : memref<8x24xf32, #tpu.memory_space<vmem>>, vector<8x24xf32>
    %cst = arith.constant dense<0.000000e+00> : vector<256x24xf32>
    %3 = tpu.matmul %1, %2, %cst {dimension_numbers = #tpu.dot_dimension_numbers<[1], [0], [0], [1], [0, 0, 1, 1], [], []>} : vector<256x8xf32>, vector<8x24xf32>, vector<256x24xf32> -> vector<256x24xf32>
    %c0_4 = arith.constant 0 : index
    %c0_5 = arith.constant 0 : index
    %4 = vector.load %arg3[%c0_4, %c0_5] : memref<1x24xf32, #tpu.memory_space<vmem>>, vector<1x24xf32>
    %5 = vector.broadcast %4 : vector<1x24xf32> to vector<256x24xf32>
    %6 = arith.addf %3, %5 : vector<256x24xf32>
    %7 = vector.shape_cast %6 : vector<256x24xf32> to vector<32x8x24xf32>
    %8 = vector.extract_strided_slice %7 {offsets = [0, 0, 0], sizes = [32, 8, 8], strides = [1, 1, 1]} : vector<32x8x24xf32> to vector<32x8x8xf32>
    %9 = vector.extract_strided_slice %7 {offsets = [0, 0, 8], sizes = [32, 8, 16], strides = [1, 1, 1]} : vector<32x8x24xf32> to vector<32x8x16xf32>
    %10 = tpu.transpose %8, [0, 2, 1] : vector<32x8x8xf32> -> vector<32x8x8xf32>
    "tpu.trace_start"() <{level = 10 : i32, message = "bhi,bix->bhx"}> : () -> ()
    %cst_6 = arith.constant dense<0.000000e+00> : vector<32x8x16xf32>
    %11 = tpu.matmul %10, %9, %cst_6 {dimension_numbers = #tpu.dot_dimension_numbers<[2], [1], [1], [2], [0, 0, 0, 1, 1, 2], [0], [0]>} : vector<32x8x8xf32>, vector<32x8x16xf32>, vector<32x8x16xf32> -> vector<32x8x16xf32>
    "tpu.trace_stop"() : () -> ()
    %12 = vector.extract_strided_slice %11 {offsets = [0, 0, 0], sizes = [32, 8, 8], strides = [1, 1, 1]} : vector<32x8x16xf32> to vector<32x8x8xf32>
    %13 = vector.extract_strided_slice %11 {offsets = [0, 0, 8], sizes = [32, 8, 8], strides = [1, 1, 1]} : vector<32x8x16xf32> to vector<32x8x8xf32>
    "tpu.trace_start"() <{level = 10 : i32, message = "bhj,bkj->bhk"}> : () -> ()
    %cst_7 = arith.constant dense<0.000000e+00> : vector<32x8x8xf32>
    %14 = tpu.matmul %12, %13, %cst_7 {dimension_numbers = #tpu.dot_dimension_numbers<[2], [2], [1], [1], [0, 0, 0, 1, 1, 1], [0], [0]>} : vector<32x8x8xf32>, vector<32x8x8xf32>, vector<32x8x8xf32> -> vector<32x8x8xf32>
    "tpu.trace_stop"() : () -> ()
    %cst_8 = arith.constant 1.250000e-01 : f32
    %15 = vector.broadcast %cst_8 : f32 to vector<32x8x8xf32>
    %16 = arith.mulf %14, %15 : vector<32x8x8xf32>
    %cst_9 = arith.constant dense<0xFF800000> : vector<32x8xf32>
    %17 = vector.multi_reduction <maximumf>, %16, %cst_9 [2] : vector<32x8x8xf32> to vector<32x8xf32>
    %18 = vector.shape_cast %17 : vector<32x8xf32> to vector<32x8x1xf32>
    %19 = vector.broadcast %18 : vector<32x8x1xf32> to vector<32x8x8xf32>
    %20 = arith.subf %16, %19 : vector<32x8x8xf32>
    %21 = math.exp %20 : vector<32x8x8xf32>
    %cst_10 = arith.constant dense<0.000000e+00> : vector<32x8xf32>
    %22 = vector.multi_reduction <add>, %21, %cst_10 [2] : vector<32x8x8xf32> to vector<32x8xf32>
    %23 = vector.shape_cast %22 : vector<32x8xf32> to vector<32x8x1xf32>
    %24 = tpu.reciprocal %23 {approx = true} : vector<32x8x1xf32> -> vector<32x8x1xf32>
    %25 = vector.broadcast %24 : vector<32x8x1xf32> to vector<32x8x8xf32>
    %26 = arith.mulf %21, %25 : vector<32x8x8xf32>
    %27 = vector.extract_strided_slice %7 {offsets = [0, 0, 16], sizes = [32, 8, 8], strides = [1, 1, 1]} : vector<32x8x24xf32> to vector<32x8x8xf32>
    %c0_11 = arith.constant 0 : index
    %c0_12 = arith.constant 0 : index
    %28 = vector.load %arg4[%c0_11, %c0_12] : memref<1x8xf32, #tpu.memory_space<vmem>>, vector<1x8xf32>
    %29 = vector.shape_cast %28 : vector<1x8xf32> to vector<1x1x8xf32>
    %30 = vector.broadcast %29 : vector<1x1x8xf32> to vector<32x8x8xf32>
    %31 = arith.mulf %27, %30 : vector<32x8x8xf32>
    %cst_13 = arith.constant dense<0.000000e+00> : vector<32x8xf32>
    %32 = vector.multi_reduction <add>, %31, %cst_13 [2] : vector<32x8x8xf32> to vector<32x8xf32>
    %33 = vector.shape_cast %32 : vector<32x8xf32> to vector<32x1x8xf32>
    %34 = vector.broadcast %33 : vector<32x1x8xf32> to vector<32x8x8xf32>
    %35 = arith.mulf %26, %34 : vector<32x8x8xf32>
    %cst_14 = arith.constant dense<0.000000e+00> : vector<32x8xf32>
    %36 = vector.multi_reduction <add>, %35, %cst_14 [2] : vector<32x8x8xf32> to vector<32x8xf32>
    %c0_15 = arith.constant 0 : index
    %c0_16 = arith.constant 0 : index
    %37 = memref.load %arg5[%c0_15, %c0_16] : memref<1x1xf32, #tpu.memory_space<smem>>
    %38 = vector.broadcast %37 : f32 to vector<32x8xf32>
    %39 = arith.addf %36, %38 : vector<32x8xf32>
    %c0_17 = arith.constant 0 : index
    %c0_18 = arith.constant 0 : index
    %40 = vector.load %arg6[%c0_17, %c0_18] : memref<32x8xf32, #tpu.memory_space<vmem>>, vector<32x8xf32>
    tpu.vector_store %arg6[%c0_17, %c0_18], %39 {strides = array<i32>} : memref<32x8xf32, #tpu.memory_space<vmem>>, vector<32x8xf32>,
    return
  }
  func.func @transform_0(%arg0: i32) -> (i32, i32, i32) {
    %c0_i32 = arith.constant 0 : i32
    %c0_i32_0 = arith.constant 0 : i32
    %c0_i32_1 = arith.constant 0 : i32
    return %arg0, %c0_i32, %c0_i32_0 : i32, i32, i32
  }
  func.func @transform_1(%arg0: i32) -> (i32, i32) {
    %c0_i32 = arith.constant 0 : i32
    %c0_i32_0 = arith.constant 0 : i32
    %c0_i32_1 = arith.constant 0 : i32
    return %c0_i32, %c0_i32_0 : i32, i32
  }
  func.func @transform_2(%arg0: i32) -> (i32, i32) {
    %c0_i32 = arith.constant 0 : i32
    %c0_i32_0 = arith.constant 0 : i32
    %c0_i32_1 = arith.constant 0 : i32
    return %c0_i32, %c0_i32_0 : i32, i32
  }
  func.func @transform_3(%arg0: i32) -> (i32, i32) {
    %c0_i32 = arith.constant 0 : i32
    %c0_i32_0 = arith.constant 0 : i32
    %c0_i32_1 = arith.constant 0 : i32
    return %c0_i32, %c0_i32_0 : i32, i32
  }
  func.func @transform_4(%arg0: i32) -> (i32, i32) {
    %c0_i32 = arith.constant 0 : i32
    %c0_i32_0 = arith.constant 0 : i32
    %c0_i32_1 = arith.constant 0 : i32
    return %c0_i32, %c0_i32_0 : i32, i32
  }
  func.func @transform_5(%arg0: i32) -> (i32, i32) {
    %c0_i32 = arith.constant 0 : i32
    %c0_i32_0 = arith.constant 0 : i32
    return %arg0, %c0_i32 : i32, i32
  }
}

</mosaic_0001>

<bundles_post_ra>
// kernel: tpu_custom_call.1
= control target key start
LH: loop header
LB: loop body
LE: loop exit
PB: predicated region body
PF: predicated region fallthrough
CT: control target
= control target key end

     0   :  { %s8858_s20 = smov 0   ;;  %s10415_s0 = inlined_call_operand.vmem [shape: f32[128,8,8], index: 0, kind: input, shape index: {}]   ;;  %s10416_s1 = inlined_call_operand.vmem [shape: f32[8,24], index: 1, kind: input, shape index: {}]   ;;  %s10417_s2 = inlined_call_operand.vmem [shape: f32[1,24], index: 2, kind: input, shape index: {}]   ;;  %s10418_s3 = inlined_call_operand.vmem [shape: f32[1,8], index: 3, kind: input, shape index: {}]   ;;  %s10419_s4 = inlined_call_operand.<no memory space> [shape: f32[1,1], index: 4, kind: input, shape index: {}]   ;;  %s10420_s5 = inlined_call_operand.vmem [shape: f32[128,8], index: 5, kind: output, shape index: {}]  }
   0x1   :  { %10 = sst [smem:[#allocation2]] %s10419_s4 }
   0x2 LB: > { %s7999_s21 = sadd.s32 4294967295, %s8818_s20   ;;  %p8003_p0 = scmp.ge.s32.totalorder %s8818_s20, 1  ;;  %s8818_s20 = sphi %s8858_s20, %s16_s20  }
   0x3   : > { %p189_p1 = scmp.lt.s32.totalorder %s8818_s20, 5 }
   0x5   : > { %p190_p2 = pnand %p8003_p0, %p189_p1 }
   0x7   : > { %193 = sbr.rel (%p190_p2) target bundleno = 1685 (0x695), region = 40 }
   0xe   : > { %v261_v0 = vld [vmem:[%s10416_s1] sm:$0xff]  ;;  %s8004_s4 = sshll.u32 %s7999_s21, 5  ;;  %vm269_vm0 = vcmask 64512   ;;  %v10421_v33 = vmov 0.0   ;;  %s8821_s30 = smov 120   ;;  %vm8822_vm1 = vmmov 0  }
   0xf   : > { %8301 = vmatprep.subr.mxu0 %v261_v0  ;;  %p218_p3 = scmp.lt.s32.totalorder %s8004_s4, 127  ;;  %8351 = vmatprep.subr.mxu1 %v10421_v33  ;;  %v8945_v34 = vld [vmem:[%s10417_s2] ss:$0 sm:$0xff]  ;;  %s8823_s8 = smov 16   ;;  %vm7354_vm2 = vcmask 1041409   ;;  %vm7355_vm3 = vcmask 1042434  }
  0x10   : > { %8302 = vmatpush3.msra.mxu0 %v261_v0  ;;  %8353 = vmatprep.mubr.msk.f32.mxu1 %vm8822_vm1, %v10421_v33  ;;  %s8824_s9 = smov 112   ;;  %s7713_s10 = sld [smem:[#allocation2]]  ;;  %vm7357_vm4 = vcmask 1043459   ;;  %vm7359_vm5 = vcmask 1044484   ;;  %vm7361_vm6 = vcmask 1045509   ;;  %vm7365_vm7 = vcmask 1047559  }
  0x11   : > { %s10446_s4 = smov (!%p218_p3, %s8004_s4), 127  ;;  %8431 = vmatprep.subr.mxu0 %v10421_v33  ;;  %s8006_s11 = sshll.u32 %s7999_s21, 2  ;;  %vm7363_vm8 = vcmask 1046534  }
  0x12   : > { %s8005_s24 = sshll.u32 %s10446_s4, 3  ;;  %p224_p4 = scmp.lt.s32.totalorder %s8006_s11, 15 }
  0x13   : > { %s8874_s27 = scalar_lea.vmem %s10415_s0, %s8005_s24 }
  0x14   : > { %v229_v1 = vld [vmem:[%s8874_s27] sm:$0xff]  ;;  %v230_v2 = vld [vmem:[%s8874_s27 + $0x8] sm:$0xff]  ;;  %v231_v3 = vld [vmem:[%s8874_s27 + $0x10] sm:$0xff]  ;;  %s10448_s11 = smov (!%p224_p4, %s8006_s11), 15 }
  0x15   : > { %8303 = vmatprep.mubr.msk.f32.mxu0 %vm269_vm0, %v229_v1  ;;  %v232_v4 = vld [vmem:[%s8874_s27 + $0x18] sm:$0xff]  ;;  %v233_v5 = vld [vmem:[%s8874_s27 + $0x20] sm:$0xff]  ;;  %v234_v6 = vld [vmem:[%s8874_s27 + $0x28] sm:$0xff]  ;;  %s8007_s12 = sshll.u32 %s10448_s11, 3 }
  0x16   : > { %8304 = vmatmul.mubr.msk.f32.vlgmr.msra.gmra.mrb[0].mxu0 %vm269_vm0, %v230_v2  ;;  %v235_v7 = vld [vmem:[%s8874_s27 + $0x30] sm:$0xff]  ;;  %v236_v8 = vld [vmem:[%s8874_s27 + $0x38] sm:$0xff]  ;;  %v237_v9 = vld [vmem:[%s8874_s27 + $0x40] sm:$0xff]  ;;  %s10330_s15 = scalar_lea.vmem %s10420_s5, %s8007_s12 }
  0x17   : > { %8306 = vmatprep.mubr.msk.f32.mxu0 %vm269_vm0, %v231_v3  ;;  %v238_v10 = vld [vmem:[%s8874_s27 + $0x48] sm:$0xff]  ;;  %v239_v11 = vld [vmem:[%s8874_s27 + $0x50] sm:$0xff]  ;;  %v240_v12 = vld [vmem:[%s8874_s27 + $0x58] sm:$0xff] }
  0x18   : > { %v241_v13 = vld [vmem:[%s8874_s27 + $0x60] sm:$0xff]  ;;  %v242_v14 = vld [vmem:[%s8874_s27 + $0x68] sm:$0xff]  ;;  %v243_v15 = vld [vmem:[%s8874_s27 + $0x70] sm:$0xff] }
  0x19   : > { %v244_v16 = vld [vmem:[%s8874_s27 + $0x78] sm:$0xff]  ;;  %v245_v17 = vld [vmem:[%s8874_s27 + $0x80] sm:$0xff]  ;;  %v246_v18 = vld [vmem:[%s8874_s27 + $0x88] sm:$0xff] }
  0x1a   : > { %8307 = vmatmul.mubr.msk.f32.gmra.mrb[2].mxu0 %vm269_vm0, %v232_v4  ;;  %v247_v19 = vld [vmem:[%s8874_s27 + $0x90] sm:$0xff]  ;;  %v248_v20 = vld [vmem:[%s8874_s27 + $0x98] sm:$0xff]  ;;  %v249_v21 = vld [vmem:[%s8874_s27 + $0xa0] sm:$0xff] }
  0x1b   : > { %8309 = vmatprep.mubr.msk.f32.mxu0 %vm269_vm0, %v233_v5  ;;  %v250_v22 = vld [vmem:[%s8874_s27 + $0xa8] sm:$0xff]  ;;  %v251_v23 = vld [vmem:[%s8874_s27 + $0xb0] sm:$0xff]  ;;  %v252_v24 = vld [vmem:[%s8874_s27 + $0xb8] sm:$0xff] }
  0x1c   : > { %v253_v25 = vld [vmem:[%s8874_s27 + $0xc0] sm:$0xff]  ;;  %v254_v26 = vld [vmem:[%s8874_s27 + $0xc8] sm:$0xff]  ;;  %v255_v27 = vld [vmem:[%s8874_s27 + $0xd0] sm:$0xff] }
  0x1d   : > { %v256_v28 = vld [vmem:[%s8874_s27 + $0xd8] sm:$0xff]  ;;  %v257_v29 = vld [vmem:[%s8874_s27 + $0xe0] sm:$0xff]  ;;  %v258_v30 = vld [vmem:[%s8874_s27 + $0xe8] sm:$0xff] }
  0x1e   : > { %8310 = vmatmul.mubr.msk.f32.gmra.mrb[4].mxu0 %vm269_vm0, %v234_v6  ;;  %v259_v31 = vld [vmem:[%s8874_s27 + $0xf0] sm:$0xff]  ;;  %v260_v32 = vld [vmem:[%s8874_s27 + $0xf8] sm:$0xff] }
  0x1f   : > { %8312 = vmatprep.mubr.msk.f32.mxu0 %vm269_vm0, %v235_v7 }
  0x22   : > { %8313 = vmatmul.mubr.msk.f32.gmra.mrb[6].mxu0 %vm269_vm0, %v236_v8 }
  0x23   : > { %8315 = vmatprep.mubr.msk.f32.mxu0 %vm269_vm0, %v237_v9 }
  0x26   : > { %8316 = vmatmul.mubr.msk.f32.gmra.mrb[8].mxu0 %vm269_vm0, %v238_v10 }
  0x27   : > { %8318 = vmatprep.mubr.msk.f32.mxu0 %vm269_vm0, %v239_v11 }
  0x2a   : > { %8319 = vmatmul.mubr.msk.f32.gmra.mrb[10].mxu0 %vm269_vm0, %v240_v12 }
  0x2b   : > { %8321 = vmatprep.mubr.msk.f32.mxu0 %vm269_vm0, %v241_v13 }
  0x2e   : > { %8322 = vmatmul.mubr.msk.f32.gmra.mrb[12].mxu0 %vm269_vm0, %v242_v14 }
  0x2f   : > { %8324 = vmatprep.mubr.msk.f32.mxu0 %vm269_vm0, %v243_v15 }
  0x32   : > { %8325 = vmatmul.mubr.msk.f32.gmra.mrb[14].mxu0 %vm269_vm0, %v244_v16 }
  0x33   : > { %8327 = vmatprep.mubr.msk.f32.mxu0 %vm269_vm0, %v245_v17 }
  0x36   : > { %8328 = vmatmul.mubr.msk.f32.gmra.mrb[16].mxu0 %vm269_vm0, %v246_v18 }
  0x37   : > { %8330 = vmatprep.mubr.msk.f32.mxu0 %vm269_vm0, %v247_v19 }
  0x3a   : > { %8331 = vmatmul.mubr.msk.f32.gmra.mrb[18].mxu0 %vm269_vm0, %v248_v20 }
  0x3b   : > { %8333 = vmatprep.mubr.msk.f32.mxu0 %vm269_vm0, %v249_v21 }
  0x3e   : > { %8334 = vmatmul.mubr.msk.f32.gmra.mrb[20].mxu0 %vm269_vm0, %v250_v22 }
  0x3f   : > { %8336 = vmatprep.mubr.msk.f32.mxu0 %vm269_vm0, %v251_v23 }
  0x42   : > { %8337 = vmatmul.mubr.msk.f32.gmra.mrb[22].mxu0 %vm269_vm0, %v252_v24 }
  0x43   : > { %8339 = vmatprep.mubr.msk.f32.mxu0 %vm269_vm0, %v253_v25 }
  0x46   : > { %8340 = vmatmul.mubr.msk.f32.gmra.mrb[24].mxu0 %vm269_vm0, %v254_v26 }
  0x47   : > { %8342 = vmatprep.mubr.msk.f32.mxu0 %vm269_vm0, %v255_v27 }
  0x4a   : > { %8343 = vmatmul.mubr.msk.f32.gmra.mrb[26].mxu0 %vm269_vm0, %v256_v28 }
  0x4b   : > { %8345 = vmatprep.mubr.msk.f32.mxu0 %vm269_vm0, %v257_v29 }
  0x4e   : > { %8346 = vmatmul.mubr.msk.f32.gmra.mrb[28].mxu0 %vm269_vm0, %v258_v30 }
  0x4f   : > { %8348 = vmatprep.mubr.msk.f32.mxu0 %vm269_vm0, %v259_v31 }
  0x52   : > { %8349 = vmatmul.mubr.msk.f32.gmra.mrb[30].mxu0 %vm269_vm0, %v260_v32 }
  0x53   : > { %8433 = vmatprep.mubr.msk.f32.mxu0 %vm8822_vm1, %v10421_v33 }
  0xe9   : > { %v8305_v35 = vpop.f32.mrb[0].mxu0 }
  0xea   : > { %v8948_v36 = vadd.f32 %v8305_v35, %v8945_v34  ;;  %v432_v37 = vpop.f32.mrb[1].mxu0 }
  0xeb   : > { %v8954_v39 = vadd.f32 %v8945_v34, %v432_v37 }
  0xec   : > { %623 = vxpose.xlu1.b32.start.end [1/1] (short) (narrow) %v8948_v36, 8  ;;  %1693 = vrot.lane.b32.xlu0 %v8948_v36, %s8821_s30 }
  0xed   : > { %v8308_v38 = vpop.f32.mrb[2].mxu0 }
  0xee   : > { %v442_v40 = vpop.f32.mrb[3].mxu0  ;;  %v8961_v52 = vadd.f32 %v8308_v38, %v8945_v34 }
  0xef   : > { %v8970_v56 = vadd.f32 %v8945_v34, %v442_v40 }
  0xf0   : > { %1616 = vrot.lane.b32.xlu0 %v8954_v39, %s8821_s30 }
  0xf1   : > { %v8311_v41 = vpop.f32.mrb[4].mxu0 }
  0xf2   : > { %v452_v42 = vpop.f32.mrb[5].mxu0  ;;  %v9008_v9 = vadd.f32 %v8311_v41, %v8945_v34 }
  0xf3   : > { %v8994_v5 = vadd.f32 %v8945_v34, %v452_v42 }
  0xf5   : > { %v8314_v43 = vpop.f32.mrb[6].mxu0 }
  0xf6   : > { %v462_v44 = vpop.f32.mrb[7].mxu0  ;;  %v9003_v8 = vadd.f32 %v8314_v43, %v8945_v34 }
  0xf7   : > { %v9013_v10 = vadd.f32 %v8945_v34, %v462_v44 }
  0xf9   : > { %v8317_v45 = vpop.f32.mrb[8].mxu0 }
  0xfa   : > { %v472_v46 = vpop.f32.mrb[9].mxu0  ;;  %v9016_v11 = vadd.f32 %v8317_v45, %v8945_v34 }
  0xfb   : > { %v9024_v13 = vadd.f32 %v8945_v34, %v472_v46 }
  0xfd   : > { %v8320_v47 = vpop.f32.mrb[10].mxu0 }
  0xfe   : > { %v482_v48 = vpop.f32.mrb[11].mxu0  ;;  %v9027_v14 = vadd.f32 %v8320_v47, %v8945_v34 }
  0xff   : > { %v9030_v15 = vadd.f32 %v8945_v34, %v482_v48 }
 0x101   : > { %v8958_v49 = vpop.f32.mrb[12].mxu0 }
 0x102   : > { %v492_v50 = vpop.f32.mrb[13].mxu0  ;;  %v9098_v30 = vadd.f32 %v8958_v49, %v8945_v34 }
 0x103   : > { %v9037_v17 = vadd.f32 %v8945_v34, %v492_v50 }
 0x105   : > { %v8326_v51 = vpop.f32.mrb[14].mxu0 }
 0x106   : > { %v502_v53 = vpop.f32.mrb[15].mxu0  ;;  %v9043_v18 = vadd.f32 %v8326_v51, %v8945_v34 }
 0x107   : > { %v9049_v19 = vadd.f32 %v8945_v34, %v502_v53 }
 0x109   : > { %v8329_v54 = vpop.f32.mrb[16].mxu0 }
 0x10a   : > { %1847 = vrot.lane.b32.xlu1 %v8961_v52, %s8821_s30  ;;  %v512_v55 = vpop.f32.mrb[17].mxu0  ;;  %v9055_v20 = vadd.f32 %v8329_v54, %v8945_v34 }
 0x10b   : > { %v9062_v21 = vadd.f32 %v8945_v34, %v512_v55 }
 0x10d   : > { %v8972_v57 = vpop.f32.mrb[18].mxu0 }
 0x10e   : > { %1770 = vrot.lane.b32.xlu1 %v8970_v56, %s8821_s30  ;;  %591 = vxpose.xlu0.b32.start.end [1/1] (short) (narrow) %v8954_v39, 8  ;;  %v8977_v58 = vpop.f32.mrb[19].mxu0  ;;  %v9110_v32 = vadd.f32 %v8972_v57, %v8945_v34 }
 0x10f   : > { %v9104_v31 = vadd.f32 %v8945_v34, %v8977_v58 }
 0x111   : > { %v8335_v59 = vpop.f32.mrb[20].mxu0 }
 0x112   : > { %687 = vxpose.xlu0.b32.start.end [1/1] (short) (narrow) %v8961_v52, 8  ;;  %v532_v60 = vpop.f32.mrb[21].mxu0  ;;  %v9065_v22 = vadd.f32 %v8335_v59, %v8945_v34 }
 0x113   : > { %v9072_v23 = vadd.f32 %v8945_v34, %v532_v60 }
 0x115   : > { %v8980_v61 = vpop.f32.mrb[22].mxu0 }
 0x116   : > { %v8982_v62 = vpop.f32.mrb[23].mxu0  ;;  %v9122_v37 = vadd.f32 %v8980_v61, %v8945_v34 }
 0x117   : > { %v9116_v35 = vadd.f32 %v8945_v34, %v8982_v62 }
 0x118   : > { %10428 = vst [vmem:[#allocation3_spill] sm:$0xff] %v9122_v37 }
 0x119   : > { %v8341_v63 = vpop.f32.mrb[24].mxu0 }
 0x11a   : > { %v552_v0 = vpop.f32.mrb[25].mxu0  ;;  %v9075_v24 = vadd.f32 %v8341_v63, %v8945_v34 }
 0x11b   : > { %v9082_v26 = vadd.f32 %v8945_v34, %v552_v0 }
 0x11d   : > { %v8984_v1 = vpop.f32.mrb[26].mxu0 }
 0x11e   : > { %v8986_v2 = vpop.f32.mrb[27].mxu0  ;;  %v9132_v40 = vadd.f32 %v8984_v1, %v8945_v34 }
 0x11f   : > { %v9128_v38 = vadd.f32 %v8945_v34, %v8986_v2 }
 0x121   : > { %v8988_v3 = vpop.f32.mrb[28].mxu0 }
 0x122   : > { %v8990_v4 = vpop.f32.mrb[29].mxu0  ;;  %v9145_v42 = vadd.f32 %v8988_v3, %v8945_v34 }
 0x123   : > { %v9141_v41 = vadd.f32 %v8945_v34, %v8990_v4 }
 0x125   : > { %v8996_v6 = vpop.f32.mrb[30].mxu0 }
 0x126   : > { %v8998_v7 = vpop.f32.mrb[31].mxu0  ;;  %v9166_v47 = vadd.f32 %v8996_v6, %v8945_v34 }
 0x127   : > { %v9158_v45 = vadd.f32 %v8945_v34, %v8998_v7 }
 0x128   : > { %10429 = vst [vmem:[#allocation4_spill] sm:$0xff] %v9166_v47 }
 0x137   : > { %655 = vxpose.xlu1.b32.start.end [1/1] (short) (narrow) %v8970_v56, 8 }
 0x13b   : > { %1924 = vrot.lane.b32.xlu0 %v8994_v5, %s8821_s30 }
 0x13f   : > { %2155 = vrot.lane.b32.xlu0 %v9003_v8, %s8821_s30 }
 0x155   : > { %2001 = vrot.lane.b32.xlu1 %v9008_v9, %s8821_s30 }
 0x159   : > { %2078 = vrot.lane.b32.xlu1 %v9013_v10, %s8821_s30 }
 0x15d   : > { %2309 = vrot.lane.b32.xlu1 %v9016_v11, %s8821_s30  ;;  %783 = vxpose.xlu0.b32.start.end [1/1] (short) (narrow) %v9013_v10, 8 }
 0x15e   : > { %v1694_v12 = vpop.permute.xlu0 %1693 }
 0x161   : > { %2232 = vrot.lane.b32.xlu1 %v9024_v13, %s8821_s30  ;;  %879 = vxpose.xlu0.b32.start.end [1/1] (short) (narrow) %v9016_v11, 8 }
 0x162   : > { %v1617_v16 = vpop.permute.xlu0 %1616 }
 0x163   : > { %8352 = vmatpush3.msra.mxu1 %v1617_v16 }
 0x164   : > { %8356 = vmatprep.subr.mxu1 %v10421_v33 }
 0x165   : > { %2463 = vrot.lane.b32.xlu1 %v9027_v14, %s8821_s30  ;;  %911 = vxpose.xlu0.b32.start.end [1/1] (short) (narrow) %v9030_v15, 8 }
 0x169   : > { %2540 = vrot.lane.b32.xlu1 %v9037_v17, %s8821_s30  ;;  %975 = vxpose.xlu0.b32.start.end [1/1] (short) (narrow) %v9037_v17, 8 }
 0x16c   : > { %v639_v25 = vpop.trf.xlu1 }
 0x16d   : > { %2771 = vrot.lane.b32.xlu1 %v9043_v18, %s8821_s30  ;;  %1039 = vxpose.xlu0.b32.start.end [1/1] (short) (narrow) %v9049_v19, 8 }
 0x171   : > { %2694 = vrot.lane.b32.xlu1 %v9049_v19, %s8821_s30 }
 0x175   : > { %2925 = vrot.lane.b32.xlu1 %v9055_v20, %s8821_s30 }
 0x179   : > { %2848 = vrot.lane.b32.xlu1 %v9062_v21, %s8821_s30 }
 0x17c   : > { %v1848_v27 = vpop.permute.xlu1 %1847 }
 0x17d   : > { %3233 = vrot.lane.b32.xlu1 %v9065_v22, %s8821_s30 }
 0x180   : > { %v1771_v29 = vpop.permute.xlu1 %1770 }
 0x181   : > { %3156 = vrot.lane.b32.xlu1 %v9072_v23, %s8821_s30 }
 0x185   : > { %3541 = vrot.lane.b32.xlu1 %v9075_v24, %s8821_s30 }
 0x189   : > { %3464 = vrot.lane.b32.xlu1 %v9082_v26, %s8821_s30 }
 0x18e   : > { %v607_v28 = vpop.trf.xlu0 }
 0x18f   : > { %8354 = vmatmul.mubr.msk.f32.vlgmr.msra.gmra.mrb[0].mxu1 %vm269_vm0, %v607_v28 }
 0x190   : > { %8357 = vmatpush3.msra.mxu1 %v1694_v12  ;;  %8358 = vmatprep.mubr.msk.f32.mxu1 %vm8822_vm1, %v10421_v33 }
 0x191   : > { %8361 = vmatprep.subr.mxu1 %v10421_v33 }
 0x192   : > { %v703_v43 = vpop.trf.xlu0 }
 0x193   : > { %8359 = vmatmul.mubr.msk.f32.vlgmr.msra.gmra.mrb[2].mxu1 %vm269_vm0, %v639_v25 }
 0x194   : > { %8362 = vmatpush3.msra.mxu1 %v1771_v29  ;;  %8363 = vmatprep.mubr.msk.f32.mxu1 %vm8822_vm1, %v10421_v33 }
 0x195   : > { %8366 = vmatprep.subr.mxu1 %v10421_v33 }
 0x196   : > { %2386 = vrot.lane.b32.xlu0 %v9030_v15, %s8821_s30 }
 0x19a   : > { %2617 = vrot.lane.b32.xlu0 %v9098_v30, %s8821_s30 }
 0x19e   : > { %3002 = vrot.lane.b32.xlu0 %v9104_v31, %s8821_s30 }
 0x1a2   : > { %3079 = vrot.lane.b32.xlu0 %v9110_v32, %s8821_s30 }
 0x1a6   : > { %3310 = vrot.lane.b32.xlu0 %v9116_v35, %s8821_s30 }
 0x1aa   : > { %3387 = vrot.lane.b32.xlu0 %v9122_v37, %s8821_s30 }
 0x1ad   : > { %v1925_v46 = vpop.permute.xlu0 %1924 }
 0x1ae   : > { %3618 = vrot.lane.b32.xlu0 %v9128_v38, %s8821_s30 }
 0x1b1   : > { %v2156_v59 = vpop.permute.xlu0 %2155 }
 0x1b2   : > { %719 = vxpose.xlu1.b32.start.end [1/1] (short) (narrow) %v8994_v5, 8  ;;  %3695 = vrot.lane.b32.xlu0 %v9132_v40, %s8821_s30 }
 0x1b6   : > { %751 = vxpose.xlu1.b32.start.end [1/1] (short) (narrow) %v9008_v9, 8  ;;  %3772 = vrot.lane.b32.xlu0 %v9141_v41, %s8821_s30 }
 0x1b7   : > { %v671_v44 = vpop.trf.xlu1 }
 0x1b8   : > { %8364 = vmatmul.mubr.msk.f32.vlgmr.msra.gmra.mrb[4].mxu1 %vm269_vm0, %v671_v44 }
 0x1b9   : > { %8367 = vmatpush3.msra.mxu1 %v1848_v27  ;;  %8368 = vmatprep.mubr.msk.f32.mxu1 %vm8822_vm1, %v10421_v33 }
 0x1ba   : > { %815 = vxpose.xlu1.b32.start.end [1/1] (short) (narrow) %v9003_v8, 8  ;;  %3849 = vrot.lane.b32.xlu0 %v9145_v42, %s8821_s30 }
 0x1bb   : > { %8371 = vmatprep.subr.mxu1 %v10421_v33 }
 0x1bc   : > { %8369 = vmatmul.mubr.msk.f32.vlgmr.msra.gmra.mrb[6].mxu1 %vm269_vm0, %v703_v43 }
 0x1bd   : > { %8372 = vmatpush3.msra.mxu1 %v1925_v46  ;;  %8373 = vmatprep.mubr.msk.f32.mxu1 %vm8822_vm1, %v10421_v33 }
 0x1be   : > { %847 = vxpose.xlu1.b32.start.end [1/1] (short) (narrow) %v9024_v13, 8  ;;  %3926 = vrot.lane.b32.xlu0 %v9158_v45, %s8821_s30 }
 0x1bf   : > { %8376 = vmatprep.subr.mxu1 %v10421_v33 }
 0x1c2   : > { %943 = vxpose.xlu1.b32.start.end [1/1] (short) (narrow) %v9027_v14, 8  ;;  %4003 = vrot.lane.b32.xlu0 %v9166_v47, %s8821_s30 }
 0x1c6   : > { %1007 = vxpose.xlu1.b32.start.end [1/1] (short) (narrow) %v9098_v30, 8 }
 0x1c7   : > { %v2002_v48 = vpop.permute.xlu1 %2001 }
 0x1ca   : > { %1071 = vxpose.xlu1.b32.start.end [1/1] (short) (narrow) %v9043_v18, 8 }
 0x1cb   : > { %v2079_v49 = vpop.permute.xlu1 %2078 }
 0x1ce   : > { %1103 = vxpose.xlu1.b32.start.end [1/1] (short) (narrow) %v9062_v21, 8 }
 0x1cf   : > { %v9178_v34 = vpop.permute.xlu1 %2309 }
 0x1d2   : > { %1135 = vxpose.xlu1.b32.start.end [1/1] (short) (narrow) %v9055_v20, 8 }
 0x1d3   : > { %v2233_v50 = vpop.permute.xlu1 %2232 }
 0x1d6   : > { %1167 = vxpose.xlu1.b32.start.end [1/1] (short) (narrow) %v9104_v31, 8 }
 0x1d7   : > { %v9182_v51 = vpop.permute.xlu1 %2463 }
 0x1da   : > { %1199 = vxpose.xlu1.b32.start.end [1/1] (short) (narrow) %v9110_v32, 8 }
 0x1db   : > { %v9185_v53 = vpop.permute.xlu1 %2540 }
 0x1dd   : > { %v799_v60 = vpop.trf.xlu0 }
 0x1de   : > { %1231 = vxpose.xlu1.b32.start.end [1/1] (short) (narrow) %v9072_v23, 8 }
 0x1df   : > { %v9188_v54 = vpop.permute.xlu1 %2771 }
 0x1e0   : > { %1263 = vxpose.xlu0.b32.start.end [1/1] (short) (narrow) %v9065_v22, 8 }
 0x1e1   : > { %v895_v61 = vpop.trf.xlu0 }
 0x1e2   : > { %1295 = vxpose.xlu1.b32.start.end [1/1] (short) (narrow) %v9116_v35, 8 }
 0x1e3   : > { %v9192_v55 = vpop.permute.xlu1 %2694 }
 0x1e4   : > { %1519 = vxpose.xlu0.b32.start.end [1/1] (short) (narrow) %v9145_v42, 8 }
 0x1e5   : > { %v927_v62 = vpop.trf.xlu0 }
 0x1e6   : > { %1327 = vxpose.xlu1.b32.start.end [1/1] (short) (narrow) %v9122_v37, 8 }
 0x1e7   : > { %v9196_v57 = vpop.permute.xlu1 %2925 }
 0x1e8   : > { %1583 = vxpose.xlu0.b32.start.end [1/1] (short) (narrow) %v9166_v47, 8  ;;  %v8137_v47 = vld [vmem:[%s10418_s3] ss:$0 sm:$0xff] }
 0x1e9   : > { %v991_v63 = vpop.trf.xlu0 }
 0x1ea   : > { %1359 = vxpose.xlu1.b32.start.end [1/1] (short) (narrow) %v9082_v26, 8 }
 0x1eb   : > { %v2849_v58 = vpop.permute.xlu1 %2848 }
 0x1ec   : > { %8432 = vmatpush3.msra.mxu0 %v2849_v58 }
 0x1ed   : > { %8441 = vmatprep.subr.mxu0 %v10421_v33  ;;  %v9208_v1 = vpop.trf.xlu0 }
 0x1ee   : > { %1391 = vxpose.xlu1.b32.start.end [1/1] (short) (narrow) %v9075_v24, 8 }
 0x1ef   : > { %v9206_v0 = vpop.permute.xlu1 %3233 }
 0x1f2   : > { %1423 = vxpose.xlu1.b32.start.end [1/1] (short) (narrow) %v9128_v38, 8 }
 0x1f3   : > { %v9210_v2 = vpop.permute.xlu1 %3156 }
 0x1f6   : > { %1455 = vxpose.xlu1.b32.start.end [1/1] (short) (narrow) %v9132_v40, 8 }
 0x1f7   : > { %v9212_v4 = vpop.permute.xlu1 %3541 }
 0x1fa   : > { %1487 = vxpose.xlu1.b32.start.end [1/1] (short) (narrow) %v9141_v41, 8 }
 0x1fb   : > { %v9214_v7 = vpop.permute.xlu1 %3464 }
 0x1fe   : > { %1551 = vxpose.xlu1.b32.start.end [1/1] (short) (narrow) %v9158_v45, 8 }
 0x208   : > { %v2387_v3 = vpop.permute.xlu0 %2386 }
 0x20c   : > { %v2618_v6 = vpop.permute.xlu0 %2617 }
 0x210   : > { %v3003_v12 = vpop.permute.xlu0 %3002 }
 0x214   : > { %v9220_v25 = vpop.permute.xlu0 %3079 }
 0x218   : > { %v3311_v29 = vpop.permute.xlu0 %3310 }
 0x21c   : > { %v9234_v44 = vpop.permute.xlu0 %3387 }
 0x232   : > { %v735_v16 = vpop.trf.xlu1 }
 0x233   : > { %8374 = vmatmul.mubr.msk.f32.vlgmr.msra.gmra.mrb[8].mxu1 %vm269_vm0, %v735_v16 }
 0x234   : > { %8377 = vmatpush3.msra.mxu1 %v2002_v48  ;;  %8378 = vmatprep.mubr.msk.f32.mxu1 %vm8822_vm1, %v10421_v33  ;;  %v9241_v48 = vpop.permute.xlu0 %3618 }
 0x235   : > { %8381 = vmatprep.subr.mxu1 %v10421_v33 }
 0x236   : > { %v767_v27 = vpop.trf.xlu1 }
 0x237   : > { %8379 = vmatmul.mubr.msk.f32.vlgmr.msra.gmra.mrb[10].mxu1 %vm269_vm0, %v767_v27 }
 0x238   : > { %8382 = vmatpush3.msra.mxu1 %v2079_v49  ;;  %8383 = vmatprep.mubr.msk.f32.mxu1 %vm8822_vm1, %v10421_v33 }
 0x239   : > { %8386 = vmatprep.subr.mxu1 %v10421_v33 }
 0x23a   : > { %v831_v28 = vpop.trf.xlu1 }
 0x23b   : > { %8384 = vmatmul.mubr.msk.f32.vlgmr.msra.gmra.mrb[12].mxu1 %vm269_vm0, %v799_v60 }
 0x23c   : > { %8387 = vmatpush3.msra.mxu1 %v2156_v59  ;;  %8388 = vmatprep.mubr.msk.f32.mxu1 %vm8822_vm1, %v10421_v33 }
 0x23d   : > { %8391 = vmatprep.subr.mxu1 %v10421_v33 }
 0x23e   : > { %v863_v43 = vpop.trf.xlu1 }
 0x23f   : > { %8389 = vmatmul.mubr.msk.f32.vlgmr.msra.gmra.mrb[14].mxu1 %vm269_vm0, %v831_v28 }
 0x240   : > { %8392 = vmatpush3.msra.mxu1 %v2233_v50  ;;  %8393 = vmatprep.mubr.msk.f32.mxu1 %vm8822_vm1, %v10421_v33 }
 0x241   : > { %8396 = vmatprep.subr.mxu1 %v10421_v33 }
 0x242   : > { %v959_v46 = vpop.trf.xlu1 }
 0x243   : > { %8394 = vmatmul.mubr.msk.f32.vlgmr.msra.gmra.mrb[16].mxu1 %vm269_vm0, %v863_v43 }
 0x244   : > { %8397 = vmatpush3.msra.mxu1 %v9178_v34  ;;  %8398 = vmatprep.mubr.msk.f32.mxu1 %vm8822_vm1, %v10421_v33  ;;  %v9248_v34 = vpop.permute.xlu0 %3695 }
 0x245   : > { %8401 = vmatprep.subr.mxu1 %v10421_v33 }
 0x246   : > { %v1023_v49 = vpop.trf.xlu1 }
 0x247   : > { %8399 = vmatmul.mubr.msk.f32.vlgmr.msra.gmra.mrb[18].mxu1 %vm269_vm0, %v895_v61 }
 0x248   : > { %8402 = vmatpush3.msra.mxu1 %v2387_v3  ;;  %8403 = vmatprep.mubr.msk.f32.mxu1 %vm8822_vm1, %v10421_v33  ;;  %v9260_v59 = vpop.permute.xlu0 %3772 }
 0x249   : > { %8406 = vmatprep.subr.mxu1 %v10421_v33 }
 0x24a   : > { %v1087_v50 = vpop.trf.xlu1 }
 0x24b   : > { %8404 = vmatmul.mubr.msk.f32.vlgmr.msra.gmra.mrb[20].mxu1 %vm269_vm0, %v927_v62 }
 0x24c   : > { %8407 = vmatpush3.msra.mxu1 %v9182_v51  ;;  %8408 = vmatprep.mubr.msk.f32.mxu1 %vm8822_vm1, %v10421_v33  ;;  %v9271_v60 = vpop.permute.xlu0 %3849 }
 0x24d   : > { %8411 = vmatprep.subr.mxu1 %v10421_v33 }
 0x24e   : > { %v1119_v58 = vpop.trf.xlu1 }
 0x24f   : > { %8409 = vmatmul.mubr.msk.f32.vlgmr.msra.gmra.mrb[22].mxu1 %vm269_vm0, %v959_v46  ;;  %8434 = vmatmul.mubr.msk.f32.vlgmr.msra.gmra.mrb[32].mxu0 %vm269_vm0, %v1119_v58 }
 0x250   : > { %8412 = vmatpush3.msra.mxu1 %v9185_v53  ;;  %8442 = vmatpush3.msra.mxu0 %v3003_v12 }
 0x251   : > { %8413 = vmatprep.mubr.msk.f32.mxu1 %vm8822_vm1, %v10421_v33  ;;  %8416 = vmatprep.subr.mxu1 %v10421_v33 }
 0x252   : > { %v1151_v51 = vpop.trf.xlu1  ;;  %8443 = vmatprep.mubr.msk.f32.mxu0 %vm8822_vm1, %v10421_v33  ;;  %8451 = vmatprep.subr.mxu0 %v10421_v33 }
 0x253   : > { %8414 = vmatmul.mubr.msk.f32.vlgmr.msra.gmra.mrb[24].mxu1 %vm269_vm0, %v991_v63 }
 0x254   : > { %8417 = vmatpush3.msra.mxu1 %v2618_v6  ;;  %8418 = vmatprep.mubr.msk.f32.mxu1 %vm8822_vm1, %v10421_v33 }
 0x255   : > { %8421 = vmatprep.subr.mxu1 %v10421_v33 }
 0x256   : > { %v1183_v53 = vpop.trf.xlu1 }
 0x257   : > { %8419 = vmatmul.mubr.msk.f32.vlgmr.msra.gmra.mrb[26].mxu1 %vm269_vm0, %v1023_v49  ;;  %8444 = vmatmul.mubr.msk.f32.vlgmr.msra.gmra.mrb[34].mxu0 %vm269_vm0, %v1183_v53 }
 0x258   : > { %8422 = vmatpush3.msra.mxu1 %v9192_v55  ;;  %8452 = vmatpush3.msra.mxu0 %v9210_v2  ;;  %v9287_v55 = vpop.permute.xlu0 %3926 }
 0x259   : > { %8423 = vmatprep.mubr.msk.f32.mxu1 %vm8822_vm1, %v10421_v33  ;;  %8426 = vmatprep.subr.mxu1 %v10421_v33 }
 0x25a   : > { %v1215_v61 = vpop.trf.xlu1  ;;  %8453 = vmatprep.mubr.msk.f32.mxu0 %vm8822_vm1, %v10421_v33  ;;  %8461 = vmatprep.subr.mxu0 %v10421_v33 }
 0x25b   : > { %8424 = vmatmul.mubr.msk.f32.vlgmr.msra.gmra.mrb[28].mxu1 %vm269_vm0, %v9208_v1 }
 0x25c   : > { %8427 = vmatpush3.msra.mxu1 %v9188_v54  ;;  %8428 = vmatprep.mubr.msk.f32.mxu1 %vm8822_vm1, %v10421_v33 }
 0x25d   : > { %8436 = vmatprep.subr.mxu1 %v10421_v33 }
 0x25e   : > { %v1247_v62 = vpop.trf.xlu1 }
 0x25f   : > { %8429 = vmatmul.mubr.msk.f32.vlgmr.msra.gmra.mrb[30].mxu1 %vm269_vm0, %v1087_v50  ;;  %8454 = vmatmul.mubr.msk.f32.vlgmr.msra.gmra.mrb[36].mxu0 %vm269_vm0, %v1247_v62 }
 0x260   : > { %8437 = vmatpush3.msra.mxu1 %v9196_v57  ;;  %8462 = vmatpush3.msra.mxu0 %v3311_v29  ;;  %v4004_v57 = vpop.permute.xlu0 %4003 }
 0x261   : > { %8438 = vmatprep.mubr.msk.f32.mxu1 %vm8822_vm1, %v10421_v33  ;;  %8446 = vmatprep.subr.mxu1 %v10421_v33 }
 0x262   : > { %v1311_v54 = vpop.trf.xlu1  ;;  %8463 = vmatprep.mubr.msk.f32.mxu0 %vm8822_vm1, %v10421_v33  ;;  %8471 = vmatprep.subr.mxu0 %v10421_v33  ;;  %v9298_v63 = vpop.f32.mrb[0].mxu1 }
 0x263   : > { %8439 = vmatmul.mubr.msk.f32.vlgmr.msra.gmra.mrb[32].mxu1 %vm269_vm0, %v1151_v51  ;;  %8464 = vmatmul.mubr.msk.f32.vlgmr.msra.gmra.mrb[38].mxu0 %vm269_vm0, %v1311_v54  ;;  %v8355_v1 = vpop.f32.mrb[1].mxu1 }
 0x264   : > { %8447 = vmatpush3.msra.mxu1 %v9220_v25  ;;  %8472 = vmatpush3.msra.mxu0 %v9214_v7  ;;  %v1279_v7 = vpop.trf.xlu0 }
 0x265   : > { %8448 = vmatprep.mubr.msk.f32.mxu1 %vm8822_vm1, %v10421_v33  ;;  %8456 = vmatprep.subr.mxu1 %v10421_v33 }
 0x266   : > { %v1343_v2 = vpop.trf.xlu1  ;;  %v9307_v3 = vpop.f32.mrb[2].mxu1  ;;  %8473 = vmatprep.mubr.msk.f32.mxu0 %vm8822_vm1, %v10421_v33  ;;  %8481 = vmatprep.subr.mxu0 %v10421_v33 }
 0x267   : > { %4157 = vrot.lane.b32.xlu0 %v9307_v3, %s8821_s30  ;;  %8449 = vmatmul.mubr.msk.f32.vlgmr.msra.gmra.mrb[34].mxu1 %vm269_vm0, %v1215_v61  ;;  %v8360_v6 = vpop.f32.mrb[3].mxu1 }
 0x268   : > { %8457 = vmatpush3.msra.mxu1 %v9206_v0  ;;  %8458 = vmatprep.mubr.msk.f32.mxu1 %vm8822_vm1, %v10421_v33  ;;  %v1535_v25 = vpop.trf.xlu0 }
 0x269   : > { %8466 = vmatprep.subr.mxu1 %v10421_v33  ;;  %4080 = vrot.lane.b32.xlu1 %v9298_v63, %s8821_s30 }
 0x26a   : > { %v1375_v12 = vpop.trf.xlu1 }
 0x26b   : > { %8459 = vmatmul.mubr.msk.f32.vlgmr.msra.gmra.mrb[36].mxu1 %vm269_vm0, %v1279_v7  ;;  %8474 = vmatmul.mubr.msk.f32.vlgmr.msra.gmra.mrb[40].mxu0 %vm269_vm0, %v1375_v12 }
 0x26c   : > { %8467 = vmatpush3.msra.mxu1 %v9234_v44  ;;  %8482 = vmatpush3.msra.mxu0 %v9241_v48  ;;  %v1599_v28 = vpop.trf.xlu0 }
 0x26d   : > { %8468 = vmatprep.mubr.msk.f32.mxu1 %vm8822_vm1, %v10421_v33  ;;  %8476 = vmatprep.subr.mxu1 %v10421_v33 }
 0x26e   : > { %v1407_v0 = vpop.trf.xlu1  ;;  %8483 = vmatprep.mubr.msk.f32.mxu0 %vm8822_vm1, %v10421_v33  ;;  %8491 = vmatprep.subr.mxu0 %v10421_v33 }
 0x26f   : > { %8469 = vmatmul.mubr.msk.f32.vlgmr.msra.gmra.mrb[38].mxu1 %vm269_vm0, %v1343_v2 }
 0x270   : > { %8477 = vmatpush3.msra.mxu1 %v9212_v4  ;;  %8478 = vmatprep.mubr.msk.f32.mxu1 %vm8822_vm1, %v10421_v33 }
 0x271   : > { %8486 = vmatprep.subr.mxu1 %v10421_v33 }
 0x272   : > { %v1439_v16 = vpop.trf.xlu1 }
 0x273   : > { %8479 = vmatmul.mubr.msk.f32.vlgmr.msra.gmra.mrb[40].mxu1 %vm269_vm0, %v1407_v0  ;;  %8484 = vmatmul.mubr.msk.f32.vlgmr.msra.gmra.mrb[42].mxu0 %vm269_vm0, %v1439_v16 }
 0x274   : > { %8487 = vmatpush3.msra.mxu1 %v9248_v34  ;;  %8492 = vmatpush3.msra.mxu0 %v9260_v59 }
 0x275   : > { %8488 = vmatprep.mubr.msk.f32.mxu1 %vm8822_vm1, %v10421_v33  ;;  %8496 = vmatprep.subr.mxu1 %v10421_v33 }
 0x276   : > { %v1471_v4 = vpop.trf.xlu1  ;;  %8493 = vmatprep.mubr.msk.f32.mxu0 %vm8822_vm1, %v10421_v33  ;;  %8501 = vmatprep.subr.mxu0 %v10421_v33 }
 0x277   : > { %8489 = vmatmul.mubr.msk.f32.vlgmr.msra.gmra.mrb[42].mxu1 %vm269_vm0, %v1471_v4 }
 0x278   : > { %8497 = vmatpush3.msra.mxu1 %v9271_v60  ;;  %8498 = vmatprep.mubr.msk.f32.mxu1 %vm8822_vm1, %v10421_v33 }
 0x279   : > { %8506 = vmatprep.subr.mxu1 %v10421_v33 }
 0x27a   : > { %v1503_v27 = vpop.trf.xlu1 }
 0x27b   : > { %8494 = vmatmul.mubr.msk.f32.vlgmr.msra.gmra.mrb[44].mxu0 %vm269_vm0, %v1503_v27  ;;  %8499 = vmatmul.mubr.msk.f32.vlgmr.msra.gmra.mrb[44].mxu1 %vm269_vm0, %v1535_v25 }
 0x27c   : > { %8502 = vmatpush3.msra.mxu0 %v9287_v55  ;;  %8507 = vmatpush3.msra.mxu1 %v4004_v57 }
 0x27d   : > { %8503 = vmatprep.mubr.msk.f32.mxu0 %vm8822_vm1, %v10421_v33  ;;  %8508 = vmatprep.mubr.msk.f32.mxu1 %vm8822_vm1, %v10421_v33 }
 0x27e   : > { %v1567_v29 = vpop.trf.xlu1  ;;  %8516 = vmatprep.subr.mxu1 %v10421_v33  ;;  %8511 = vmatprep.subr.mxu0 %v10421_v33 }
 0x27f   : > { %8504 = vmatmul.mubr.msk.f32.vlgmr.msra.gmra.mrb[46].mxu0 %vm269_vm0, %v1567_v29  ;;  %8509 = vmatmul.mubr.msk.f32.vlgmr.msra.gmra.mrb[46].mxu1 %vm269_vm0, %v1599_v28 }
 0x280   : > { %8518 = vmatprep.mubr.msk.f32.mxu1 %vm8822_vm1, %v10421_v33  ;;  %8513 = vmatprep.mubr.msk.f32.mxu0 %vm8822_vm1, %v10421_v33 }
 0x28b   : > { %v1842_v43 = vpop.f32.mrb[4].mxu1 }
 0x28c   : > { %4234 = vrot.lane.b32.xlu1 %v1842_v43, %s8821_s30  ;;  %v8365_v44 = vpop.f32.mrb[5].mxu1 }
 0x28f   : > { %v1919_v46 = vpop.f32.mrb[6].mxu1 }
 0x290   : > { %4311 = vrot.lane.b32.xlu1 %v1919_v46, %s8821_s30  ;;  %v8370_v48 = vpop.f32.mrb[7].mxu1 }
 0x2d9   : > { %v4158_v49 = vpop.permute.xlu0 %4157 }
 0x2da   : > { %8517 = vmatpush3.xpose.msk.msra.mxu1 %vm269_vm0, %v4158_v49 }
 0x2db   : > { %v4081_v50 = vpop.permute.xlu1 %4080  ;;  %8526 = vmatprep.subr.mxu1 %v10421_v33 }
 0x2dc   : > { %8512 = vmatpush3.xpose.msk.msra.mxu0 %vm269_vm0, %v4081_v50 }
 0x2dd   : > { %8519 = vmatmul.mubr.msk.f32.vlgmr.msra.gmra.mrb[48].mxu1 %vm269_vm0, %v9307_v3  ;;  %8521 = vmatprep.subr.mxu0 %v10421_v33 }
 0x2de   : > { %8528 = vmatprep.mubr.msk.f32.mxu1 %vm8822_vm1, %v10421_v33 }
 0x2df   : > { %8514 = vmatmul.mubr.msk.f32.vlgmr.msra.gmra.mrb[48].mxu0 %vm269_vm0, %v9298_v63 }
 0x2e0   : > { %8523 = vmatprep.mubr.msk.f32.mxu0 %vm8822_vm1, %v10421_v33 }
 0x2fe   : > { %v4235_v34 = vpop.permute.xlu1 %4234 }
 0x2ff   : > { %8522 = vmatpush3.xpose.msk.msra.mxu0 %vm269_vm0, %v4235_v34 }
 0x300   : > { %8531 = vmatprep.subr.mxu0 %v10421_v33 }
 0x302   : > { %v4312_v58 = vpop.permute.xlu1 %4311  ;;  %8524 = vmatmul.mubr.msk.f32.vlgmr.msra.gmra.mrb[50].mxu0 %vm269_vm0, %v1842_v43 }
 0x303   : > { %8527 = vmatpush3.xpose.msk.msra.mxu1 %vm269_vm0, %v4312_v58  ;;  %8533 = vmatprep.mubr.msk.f32.mxu0 %vm8822_vm1, %v10421_v33 }
 0x304   : > { %8536 = vmatprep.subr.mxu1 %v10421_v33 }
 0x306   : > { %v9387_v59 = vpop.f32.mrb[8].mxu1  ;;  %8529 = vmatmul.mubr.msk.f32.vlgmr.msra.gmra.mrb[50].mxu1 %vm269_vm0, %v1919_v46 }
 0x307   : > { %4388 = vrot.lane.b32.xlu1 %v9387_v59, %s8821_s30  ;;  %v8375_v51 = vpop.f32.mrb[9].mxu1  ;;  %8538 = vmatprep.mubr.msk.f32.mxu1 %vm8822_vm1, %v10421_v33 }
 0x30a   : > { %v9394_v53 = vpop.f32.mrb[10].mxu1 }
 0x30b   : > { %4465 = vrot.lane.b32.xlu1 %v9394_v53, %s8821_s30  ;;  %v8380_v60 = vpop.f32.mrb[11].mxu1 }
 0x30e   : > { %v9398_v61 = vpop.f32.mrb[12].mxu1 }
 0x30f   : > { %4542 = vrot.lane.b32.xlu0 %v9398_v61, %s8821_s30  ;;  %v8385_v55 = vpop.f32.mrb[13].mxu1 }
 0x312   : > { %v9402_v62 = vpop.f32.mrb[14].mxu1 }
 0x313   : > { %4619 = vrot.lane.b32.xlu1 %v9402_v62, %s8821_s30  ;;  %v8390_v54 = vpop.f32.mrb[15].mxu1 }
 0x316   : > { %v9406_v63 = vpop.f32.mrb[16].mxu1 }
 0x317   : > { %4696 = vrot.lane.b32.xlu0 %v9406_v63, %s8821_s30  ;;  %v8395_v1 = vpop.f32.mrb[17].mxu1 }
 0x31a   : > { %v9410_v57 = vpop.f32.mrb[18].mxu1 }
 0x31b   : > { %4773 = vrot.lane.b32.xlu1 %v9410_v57, %s8821_s30  ;;  %v8400_v2 = vpop.f32.mrb[19].mxu1 }
 0x31e   : > { %v9414_v3 = vpop.f32.mrb[20].mxu1 }
 0x31f   : > { %4850 = vrot.lane.b32.xlu0 %v9414_v3, %s8821_s30  ;;  %v8405_v6 = vpop.f32.mrb[21].mxu1 }
 0x322   : > { %v9418_v7 = vpop.f32.mrb[22].mxu1  ;;  %v9420_v12 = vpop.f32.mrb[32].mxu0 }
 0x323   : > { %4927 = vrot.lane.b32.xlu1 %v9418_v7, %s8821_s30  ;;  %v8410_v0 = vpop.f32.mrb[23].mxu1  ;;  %v8435_v16 = vpop.f32.mrb[33].mxu0 }
 0x326   : > { %v9424_v4 = vpop.f32.mrb[24].mxu1 }
 0x327   : > { %5004 = vrot.lane.b32.xlu0 %v9424_v4, %s8821_s30  ;;  %v8415_v25 = vpop.f32.mrb[25].mxu1 }
 0x32a   : > { %v9428_v27 = vpop.f32.mrb[26].mxu1  ;;  %v9430_v28 = vpop.f32.mrb[34].mxu0 }
 0x32b   : > { %5081 = vrot.lane.b32.xlu1 %v9428_v27, %s8821_s30  ;;  %v8420_v29 = vpop.f32.mrb[27].mxu1  ;;  %v8445_v43 = vpop.f32.mrb[35].mxu0 }
 0x32e   : > { %v9434_v44 = vpop.f32.mrb[28].mxu1 }
 0x32f   : > { %5158 = vrot.lane.b32.xlu0 %v9434_v44, %s8821_s30  ;;  %v8425_v46 = vpop.f32.mrb[29].mxu1 }
 0x332   : > { %v9438_v48 = vpop.f32.mrb[30].mxu1  ;;  %v9440_v49 = vpop.f32.mrb[36].mxu0 }
 0x333   : > { %5312 = vrot.lane.b32.xlu0 %v9420_v12, %s8821_s30  ;;  %5235 = vrot.lane.b32.xlu1 %v9438_v48, %s8821_s30  ;;  %v8430_v50 = vpop.f32.mrb[31].mxu1  ;;  %v8455_v34 = vpop.f32.mrb[37].mxu0 }
 0x336   : > { %v9446_v58 = vpop.f32.mrb[32].mxu1  ;;  %v9448_v51 = vpop.f32.mrb[38].mxu0 }
 0x337   : > { %5389 = vrot.lane.b32.xlu1 %v9446_v58, %s8821_s30  ;;  %v8440_v60 = vpop.f32.mrb[33].mxu1  ;;  %5466 = vrot.lane.b32.xlu0 %v9430_v28, %s8821_s30  ;;  %v8465_v55 = vpop.f32.mrb[39].mxu0 }
 0x33a   : > { %v9454_v54 = vpop.f32.mrb[34].mxu1 }
 0x33b   : > { %5620 = vrot.lane.b32.xlu0 %v9440_v49, %s8821_s30  ;;  %5543 = vrot.lane.b32.xlu1 %v9454_v54, %s8821_s30  ;;  %v8450_v1 = vpop.f32.mrb[35].mxu1 }
 0x33e   : > { %v9460_v2 = vpop.f32.mrb[36].mxu1  ;;  %v9462_v6 = vpop.f32.mrb[40].mxu0 }
 0x33f   : > { %5774 = vrot.lane.b32.xlu0 %v9448_v51, %s8821_s30  ;;  %5697 = vrot.lane.b32.xlu1 %v9460_v2, %s8821_s30  ;;  %v8460_v0 = vpop.f32.mrb[37].mxu1  ;;  %v8475_v16 = vpop.f32.mrb[41].mxu0 }
 0x342   : > { %v9468_v25 = vpop.f32.mrb[38].mxu1 }
 0x343   : > { %5928 = vrot.lane.b32.xlu0 %v9462_v6, %s8821_s30  ;;  %5851 = vrot.lane.b32.xlu1 %v9468_v25, %s8821_s30  ;;  %v8470_v29 = vpop.f32.mrb[39].mxu1 }
 0x346   : > { %v9474_v43 = vpop.f32.mrb[40].mxu1  ;;  %v9476_v46 = vpop.f32.mrb[42].mxu0 }
 0x347   : > { %6082 = vrot.lane.b32.xlu0 %v9476_v46, %s8821_s30  ;;  %6005 = vrot.lane.b32.xlu1 %v9474_v43, %s8821_s30  ;;  %v8480_v50 = vpop.f32.mrb[41].mxu1  ;;  %v8485_v34 = vpop.f32.mrb[43].mxu0 }
 0x34a   : > { %v9482_v60 = vpop.f32.mrb[42].mxu1 }
 0x34b   : > { %6159 = vrot.lane.b32.xlu1 %v9482_v60, %s8821_s30  ;;  %v8490_v55 = vpop.f32.mrb[43].mxu1 }
 0x34e   : > { %v9486_v1 = vpop.f32.mrb[44].mxu0  ;;  %v9488_v0 = vpop.f32.mrb[44].mxu1 }
 0x34f   : > { %6236 = vrot.lane.b32.xlu0 %v9486_v1, %s8821_s30  ;;  %6313 = vrot.lane.b32.xlu1 %v9488_v0, %s8821_s30  ;;  %v8495_v16 = vpop.f32.mrb[45].mxu0  ;;  %v8500_v29 = vpop.f32.mrb[45].mxu1 }
 0x350   : > { %v10430_v29 = vmov 0.0  }
 0x352   : > { %v9494_v50 = vpop.f32.mrb[46].mxu0  ;;  %v9496_v34 = vpop.f32.mrb[46].mxu1 }
 0x353   : > { %6390 = vrot.lane.b32.xlu0 %v9494_v50, %s8821_s30  ;;  %6467 = vrot.lane.b32.xlu1 %v9496_v34, %s8821_s30  ;;  %v8505_v55 = vpop.f32.mrb[47].mxu0  ;;  %v8510_v33 = vpop.f32.mrb[47].mxu1 }
 0x357   : > { %6933 = vrot.lane.b32.xlu0 %v8137_v47, %s8823_s8 }
 0x379   : > { %v4389_v16 = vpop.permute.xlu1 %4388 }
 0x37a   : > { %8532 = vmatpush3.xpose.msk.msra.mxu0 %vm269_vm0, %v4389_v16 }
 0x37b   : > { %8541 = vmatprep.subr.mxu0 %v10430_v29 }
 0x37d   : > { %v4466_v37 = vpop.permute.xlu1 %4465  ;;  %8534 = vmatmul.mubr.msk.f32.vlgmr.msra.gmra.mrb[52].mxu0 %vm269_vm0, %v9387_v59 }
 0x37e   : > { %8537 = vmatpush3.xpose.msk.msra.mxu1 %vm269_vm0, %v4466_v37  ;;  %8543 = vmatprep.mubr.msk.f32.mxu0 %vm8822_vm1, %v10430_v29 }
 0x37f   : > { %8546 = vmatprep.subr.mxu1 %v10430_v29 }
 0x381   : > { %8539 = vmatmul.mubr.msk.f32.vlgmr.msra.gmra.mrb[52].mxu1 %vm269_vm0, %v9394_v53  ;;  %v4543_v33 = vpop.permute.xlu0 %4542 }
 0x382   : > { %8542 = vmatpush3.xpose.msk.msra.mxu0 %vm269_vm0, %v4543_v33  ;;  %8548 = vmatprep.mubr.msk.f32.mxu1 %vm8822_vm1, %v10430_v29 }
 0x383   : > { %8551 = vmatprep.subr.mxu0 %v10430_v29 }
 0x385   : > { %v4620_v47 = vpop.permute.xlu1 %4619  ;;  %8544 = vmatmul.mubr.msk.f32.vlgmr.msra.gmra.mrb[54].mxu0 %vm269_vm0, %v9398_v61 }
 0x386   : > { %8547 = vmatpush3.xpose.msk.msra.mxu1 %vm269_vm0, %v4620_v47  ;;  %8553 = vmatprep.mubr.msk.f32.mxu0 %vm8822_vm1, %v10430_v29 }
 0x387   : > { %8556 = vmatprep.subr.mxu1 %v10430_v29 }
 0x389   : > { %8549 = vmatmul.mubr.msk.f32.vlgmr.msra.gmra.mrb[54].mxu1 %vm269_vm0, %v9402_v62  ;;  %v4697_v37 = vpop.permute.xlu0 %4696 }
 0x38a   : > { %8552 = vmatpush3.xpose.msk.msra.mxu0 %vm269_vm0, %v4697_v37  ;;  %8558 = vmatprep.mubr.msk.f32.mxu1 %vm8822_vm1, %v10430_v29 }
 0x38b   : > { %8561 = vmatprep.subr.mxu0 %v10430_v29 }
 0x38d   : > { %v4774_v59 = vpop.permute.xlu1 %4773  ;;  %8554 = vmatmul.mubr.msk.f32.vlgmr.msra.gmra.mrb[56].mxu0 %vm269_vm0, %v9406_v63 }
 0x38e   : > { %8557 = vmatpush3.xpose.msk.msra.mxu1 %vm269_vm0, %v4774_v59  ;;  %8563 = vmatprep.mubr.msk.f32.mxu0 %vm8822_vm1, %v10430_v29 }
 0x38f   : > { %8566 = vmatprep.subr.mxu1 %v10430_v29 }
 0x391   : > { %8559 = vmatmul.mubr.msk.f32.vlgmr.msra.gmra.mrb[56].mxu1 %vm269_vm0, %v9410_v57  ;;  %v4851_v53 = vpop.permute.xlu0 %4850 }
 0x392   : > { %8562 = vmatpush3.xpose.msk.msra.mxu0 %vm269_vm0, %v4851_v53  ;;  %8568 = vmatprep.mubr.msk.f32.mxu1 %vm8822_vm1, %v10430_v29 }
 0x393   : > { %8571 = vmatprep.subr.mxu0 %v10430_v29 }
 0x395   : > { %v4928_v61 = vpop.permute.xlu1 %4927  ;;  %8564 = vmatmul.mubr.msk.f32.vlgmr.msra.gmra.mrb[58].mxu0 %vm269_vm0, %v9414_v3 }
 0x396   : > { %8567 = vmatpush3.xpose.msk.msra.mxu1 %vm269_vm0, %v4928_v61  ;;  %8573 = vmatprep.mubr.msk.f32.mxu0 %vm8822_vm1, %v10430_v29  ;;  %v10431_v61 = vld [vmem:[#allocation3_spill] sm:$0xff] }
 0x397   : > { %8576 = vmatprep.subr.mxu1 %v10430_v29 }
 0x399   : > { %8569 = vmatmul.mubr.msk.f32.vlgmr.msra.gmra.mrb[58].mxu1 %vm269_vm0, %v9418_v7  ;;  %v5005_v62 = vpop.permute.xlu0 %5004 }
 0x39a   : > { %8572 = vmatpush3.xpose.msk.msra.mxu0 %vm269_vm0, %v5005_v62  ;;  %8578 = vmatprep.mubr.msk.f32.mxu1 %vm8822_vm1, %v10430_v29  ;;  %v10432_v62 = vld [vmem:[#allocation4_spill] sm:$0xff] }
 0x39b   : > { %8581 = vmatprep.subr.mxu0 %v10430_v29 }
 0x39d   : > { %v5082_v63 = vpop.permute.xlu1 %5081  ;;  %8574 = vmatmul.mubr.msk.f32.vlgmr.msra.gmra.mrb[60].mxu0 %vm269_vm0, %v9424_v4 }
 0x39e   : > { %8577 = vmatpush3.xpose.msk.msra.mxu1 %vm269_vm0, %v5082_v63  ;;  %8583 = vmatprep.mubr.msk.f32.mxu0 %vm8822_vm1, %v10430_v29 }
 0x39f   : > { %8586 = vmatprep.subr.mxu1 %v10430_v29 }
 0x3a1   : > { %8579 = vmatmul.mubr.msk.f32.vlgmr.msra.gmra.mrb[60].mxu1 %vm269_vm0, %v9428_v27  ;;  %v5159_v57 = vpop.permute.xlu0 %5158 }
 0x3a2   : > { %8582 = vmatpush3.xpose.msk.msra.mxu0 %vm269_vm0, %v5159_v57  ;;  %8588 = vmatprep.mubr.msk.f32.mxu1 %vm8822_vm1, %v10430_v29 }
 0x3a3   : > { %8591 = vmatprep.subr.mxu0 %v10430_v29 }
 0x3a5   : > { %v5236_v3 = vpop.permute.xlu1 %5235  ;;  %8584 = vmatmul.mubr.msk.f32.vlgmr.msra.gmra.mrb[62].mxu0 %vm269_vm0, %v9434_v44  ;;  %v5313_v7 = vpop.permute.xlu0 %5312 }
 0x3a6   : > { %8587 = vmatpush3.xpose.msk.msra.mxu1 %vm269_vm0, %v5236_v3  ;;  %8592 = vmatpush3.xpose.msk.msra.mxu0 %vm269_vm0, %v5313_v7 }
 0x3a7   : > { %8593 = vmatprep.mubr.msk.f32.mxu0 %vm8822_vm1, %v10430_v29  ;;  %8596 = vmatprep.subr.mxu1 %v10430_v29 }
 0x3a8   : > { %8601 = vmatprep.subr.mxu0 %v10430_v29 }
 0x3a9   : > { %v5390_v4 = vpop.permute.xlu1 %5389  ;;  %8589 = vmatmul.mubr.msk.f32.vlgmr.msra.gmra.mrb[62].mxu1 %vm269_vm0, %v9438_v48  ;;  %8594 = vmatmul.mubr.msk.f32.vlgmr.msra.gmra.mrb[64].mxu0 %vm269_vm0, %v9420_v12  ;;  %v5467_v27 = vpop.permute.xlu0 %5466 }
 0x3aa   : > { %8597 = vmatpush3.xpose.msk.msra.mxu1 %vm269_vm0, %v5390_v4  ;;  %8602 = vmatpush3.xpose.msk.msra.mxu0 %vm269_vm0, %v5467_v27 }
 0x3ab   : > { %8598 = vmatprep.mubr.msk.f32.mxu1 %vm8822_vm1, %v10430_v29  ;;  %8603 = vmatprep.mubr.msk.f32.mxu0 %vm8822_vm1, %v10430_v29 }
 0x3ac   : > { %8606 = vmatprep.subr.mxu1 %v10430_v29  ;;  %8611 = vmatprep.subr.mxu0 %v10430_v29 }
 0x3ad   : > { %v5544_v44 = vpop.permute.xlu1 %5543  ;;  %8599 = vmatmul.mubr.msk.f32.vlgmr.msra.gmra.mrb[64].mxu1 %vm269_vm0, %v9446_v58  ;;  %8604 = vmatmul.mubr.msk.f32.vlgmr.msra.gmra.mrb[66].mxu0 %vm269_vm0, %v9430_v28  ;;  %v5621_v12 = vpop.permute.xlu0 %5620 }
 0x3ae   : > { %8607 = vmatpush3.xpose.msk.msra.mxu1 %vm269_vm0, %v5544_v44  ;;  %8612 = vmatpush3.xpose.msk.msra.mxu0 %vm269_vm0, %v5621_v12 }
 0x3af   : > { %8608 = vmatprep.mubr.msk.f32.mxu1 %vm8822_vm1, %v10430_v29  ;;  %8613 = vmatprep.mubr.msk.f32.mxu0 %vm8822_vm1, %v10430_v29 }
 0x3b0   : > { %v9597_v48 = vpop.f32.mrb[48].mxu1  ;;  %8616 = vmatprep.subr.mxu1 %v10430_v29  ;;  %8621 = vmatprep.subr.mxu0 %v10430_v29 }
 0x3b1   : > { %v5698_v58 = vpop.permute.xlu1 %5697  ;;  %v8520_v55 = vpop.f32.mrb[49].mxu1  ;;  %8609 = vmatmul.mubr.msk.f32.vlgmr.msra.gmra.mrb[66].mxu1 %vm269_vm0, %v9454_v54  ;;  %8614 = vmatmul.mubr.msk.f32.vlgmr.msra.gmra.mrb[68].mxu0 %vm269_vm0, %v9440_v49 }
 0x3b2   : > { %v5775_v28 = vpop.permute.xlu0 %5774  ;;  %8617 = vmatpush3.xpose.msk.msra.mxu1 %vm269_vm0, %v5698_v58  ;;  %8618 = vmatprep.mubr.msk.f32.mxu1 %vm8822_vm1, %v10430_v29  ;;  %v9608_v16 = vpop.f32.mrb[48].mxu0 }
 0x3b3   : > { %8622 = vmatpush3.xpose.msk.msra.mxu0 %vm269_vm0, %v5775_v28  ;;  %8623 = vmatprep.mubr.msk.f32.mxu0 %vm8822_vm1, %v10430_v29  ;;  %v8515_v33 = vpop.f32.mrb[49].mxu0 }
 0x3b4   : > { %8626 = vmatprep.subr.mxu1 %v10430_v29  ;;  %8631 = vmatprep.subr.mxu0 %v10430_v29 }
 0x3b5   : > { %v5852_v54 = vpop.permute.xlu1 %5851  ;;  %8619 = vmatmul.mubr.msk.f32.vlgmr.msra.gmra.mrb[68].mxu1 %vm269_vm0, %v9460_v2 }
 0x3b6   : > { %8624 = vmatmul.mubr.msk.f32.vlgmr.msra.gmra.mrb[70].mxu0 %vm269_vm0, %v9448_v51  ;;  %v5929_v49 = vpop.permute.xlu0 %5928  ;;  %8627 = vmatpush3.xpose.msk.msra.mxu1 %vm269_vm0, %v5852_v54 }
 0x3b7   : > { %8632 = vmatpush3.xpose.msk.msra.mxu0 %vm269_vm0, %v5929_v49  ;;  %8628 = vmatprep.mubr.msk.f32.mxu1 %vm8822_vm1, %v10430_v29 }
 0x3b8   : > { %8633 = vmatprep.mubr.msk.f32.mxu0 %vm8822_vm1, %v10430_v29  ;;  %8636 = vmatprep.subr.mxu1 %v10430_v29 }
 0x3b9   : > { %v6006_v47 = vpop.permute.xlu1 %6005  ;;  %8629 = vmatmul.mubr.msk.f32.vlgmr.msra.gmra.mrb[70].mxu1 %vm269_vm0, %v9468_v25  ;;  %8641 = vmatprep.subr.mxu0 %v10430_v29 }
 0x3ba   : > { %8634 = vmatmul.mubr.msk.f32.vlgmr.msra.gmra.mrb[72].mxu0 %vm269_vm0, %v9462_v6  ;;  %v6083_v51 = vpop.permute.xlu0 %6082  ;;  %8637 = vmatpush3.xpose.msk.msra.mxu1 %vm269_vm0, %v6006_v47 }
 0x3bb   : > { %8642 = vmatpush3.xpose.msk.msra.mxu0 %vm269_vm0, %v6083_v51  ;;  %8638 = vmatprep.mubr.msk.f32.mxu1 %vm8822_vm1, %v10430_v29 }
 0x3bc   : > { %8643 = vmatprep.mubr.msk.f32.mxu0 %vm8822_vm1, %v10430_v29  ;;  %8646 = vmatprep.subr.mxu1 %v10430_v29 }
 0x3bd   : > { %v6160_v2 = vpop.permute.xlu1 %6159  ;;  %8639 = vmatmul.mubr.msk.f32.vlgmr.msra.gmra.mrb[72].mxu1 %vm269_vm0, %v9474_v43  ;;  %8651 = vmatprep.subr.mxu0 %v10430_v29 }
 0x3be   : > { %8644 = vmatmul.mubr.msk.f32.vlgmr.msra.gmra.mrb[74].mxu0 %vm269_vm0, %v9476_v46  ;;  %8647 = vmatpush3.xpose.msk.msra.mxu1 %vm269_vm0, %v6160_v2 }
 0x3bf   : > { %8648 = vmatprep.mubr.msk.f32.mxu1 %vm8822_vm1, %v10430_v29  ;;  %8656 = vmatprep.subr.mxu1 %v10430_v29 }
 0x3c0   : > { %8653 = vmatprep.mubr.msk.f32.mxu0 %vm8822_vm1, %v10430_v29 }
 0x3c1   : > { %v6314_v6 = vpop.permute.xlu1 %6313  ;;  %8649 = vmatmul.mubr.msk.f32.vlgmr.msra.gmra.mrb[74].mxu1 %vm269_vm0, %v9482_v60  ;;  %v6237_v25 = vpop.permute.xlu0 %6236 }
 0x3c2   : > { %8652 = vmatpush3.xpose.msk.msra.mxu0 %vm269_vm0, %v6237_v25  ;;  %8657 = vmatpush3.xpose.msk.msra.mxu1 %vm269_vm0, %v6314_v6 }
 0x3c3   : > { %8658 = vmatprep.mubr.msk.f32.mxu1 %vm8822_vm1, %v10430_v29  ;;  %8661 = vmatprep.subr.mxu0 %v10430_v29 }
 0x3c4   : > { %8666 = vmatprep.subr.mxu1 %v10430_v29 }
 0x3c5   : > { %v6468_v43 = vpop.permute.xlu1 %6467  ;;  %8654 = vmatmul.mubr.msk.f32.vlgmr.msra.gmra.mrb[76].mxu0 %vm269_vm0, %v9486_v1  ;;  %8659 = vmatmul.mubr.msk.f32.vlgmr.msra.gmra.mrb[76].mxu1 %vm269_vm0, %v9488_v0  ;;  %v6391_v46 = vpop.permute.xlu0 %6390 }
 0x3c6   : > { %8662 = vmatpush3.xpose.msk.msra.mxu0 %vm269_vm0, %v6391_v46  ;;  %8667 = vmatpush3.xpose.msk.msra.mxu1 %vm269_vm0, %v6468_v43 }
 0x3c7   : > { %8663 = vmatprep.mubr.msk.f32.mxu0 %vm8822_vm1, %v10430_v29  ;;  %8668 = vmatprep.mubr.msk.f32.mxu1 %vm8822_vm1, %v10430_v29 }
 0x3c9   : > { %8664 = vmatmul.mubr.msk.f32.vlgmr.msra.gmra.mrb[78].mxu0 %vm269_vm0, %v9494_v50  ;;  %8669 = vmatmul.mubr.msk.f32.vlgmr.msra.gmra.mrb[78].mxu1 %vm269_vm0, %v9496_v34  ;;  %v9671_v60 = vpop.permute.xlu0 %6933 }
 0x3ca   : > { %v6937_v1 = vmul.f32 %v9671_v60, %v8948_v36  ;;  %v6936_v0 = vmul.f32 %v9671_v60, %v8954_v39  ;;  %v6944_v29 = vmul.f32 %v9671_v60, %v9024_v13  ;;  %v6945_v50 = vmul.f32 %v9671_v60, %v9016_v11 }
 0x3cb   : > { %v6952_v36 = vmul.f32 %v9671_v60, %v9062_v21  ;;  %v6953_v39 = vmul.f32 %v9671_v60, %v9055_v20  ;;  %v6960_v11 = vmul.f32 %v9671_v60, %v9082_v26  ;;  %v6961_v37 = vmul.f32 %v9671_v60, %v9075_v24 }
 0x3cc   : > { %7002 = vrot.lane.b32.xlu1 %v6937_v1, %s8824_s9  ;;  %7000 = vrot.lane.b32.xlu0 %v6936_v0, %s8824_s9  ;;  %v6938_v59 = vmul.f32 %v9671_v60, %v8970_v56  ;;  %v6946_v53 = vmul.f32 %v9671_v60, %v9030_v15  ;;  %v6954_v24 = vmul.f32 %v9671_v60, %v9104_v31  ;;  %v9784_v1 = vmul.f32 0.125, %v9597_v48 }
 0x3cd   : > { %v6962_v26 = vmul.f32 %v9671_v60, %v9128_v38  ;;  %v6939_v56 = vmul.f32 %v9671_v60, %v8961_v52  ;;  %v6947_v15 = vmul.f32 %v9671_v60, %v9027_v14  ;;  %v6955_v31 = vmul.f32 %v9671_v60, %v9110_v32 }
 0x3ce   : > { %v6963_v38 = vmul.f32 %v9671_v60, %v9132_v40  ;;  %v6940_v52 = vmul.f32 %v9671_v60, %v8994_v5  ;;  %v6948_v14 = vmul.f32 %v9671_v60, %v9037_v17  ;;  %v6956_v32 = vmul.f32 %v9671_v60, %v9072_v23 }
 0x3cf   : > { %v6964_v40 = vmul.f32 %v9671_v60, %v9141_v41  ;;  %v6941_v5 = vmul.f32 %v9671_v60, %v9008_v9  ;;  %v6949_v17 = vmul.f32 %v9671_v60, %v9098_v30  ;;  %v6957_v23 = vmul.f32 %v9671_v60, %v9065_v22 }
 0x3d0   : > { %7016 = vrot.lane.b32.xlu1 %v6944_v29, %s8824_s9  ;;  %7018 = vrot.lane.b32.xlu0 %v6945_v50, %s8824_s9  ;;  %v6965_v41 = vmul.f32 %v9671_v60, %v9145_v42  ;;  %v6942_v9 = vmul.f32 %v9671_v60, %v9013_v10  ;;  %v6950_v30 = vmul.f32 %v9671_v60, %v9049_v19  ;;  %v9787_v0 = vmul.f32 0.125, %v9608_v16 }
 0x3d1   : > { %v6958_v22 = vmul.f32 %v9671_v60, %v9116_v35  ;;  %v6966_v42 = vmul.f32 %v9671_v60, %v9158_v45  ;;  %v6943_v10 = vmul.f32 %v9671_v60, %v9003_v8  ;;  %v6951_v19 = vmul.f32 %v9671_v60, %v9043_v18 }
 0x3d2   : > { %v6959_v35 = vmul.f32 %v9671_v60, %v10431_v61  ;;  %v6967_v45 = vmul.f32 %v9671_v60, %v10432_v62  ;;  %v6575_v48 = vsel %vm269_vm0, %v9787_v0, -inf }
 0x3d4   : > { %7032 = vrot.lane.b32.xlu1 %v6952_v36, %s8824_s9  ;;  %7034 = vrot.lane.b32.xlu0 %v6953_v39, %s8824_s9 }
 0x3d5   : > { %v9691_v34 = vpop.f32.mrb[50].mxu0 }
 0x3d6   : > { %v8525_v13 = vpop.f32.mrb[51].mxu0 }
 0x3d7   : > { %v9792_v13 = vmul.f32 0.125, %v9691_v34 }
 0x3d8   : > { %7048 = vrot.lane.b32.xlu1 %v6960_v11, %s8824_s9  ;;  %7050 = vrot.lane.b32.xlu0 %v6961_v37, %s8824_s9  ;;  %v6578_v11 = vsel %vm269_vm0, %v9784_v1, -inf }
 0x3d9   : > { %v9699_v21 = vpop.f32.mrb[50].mxu1 }
 0x3da   : > { %v8530_v20 = vpop.f32.mrb[51].mxu1 }
 0x3db   : > { %v9799_v20 = vmul.f32 0.125, %v9699_v21 }
 0x3dc   : > { %7004 = vrot.lane.b32.xlu1 %v6938_v59, %s8824_s9  ;;  %7020 = vrot.lane.b32.xlu0 %v6946_v53, %s8824_s9  ;;  %v6581_v59 = vsel %vm269_vm0, %v9792_v13, -inf }
 0x3e0   : > { %7036 = vrot.lane.b32.xlu1 %v6954_v24, %s8824_s9  ;;  %7052 = vrot.lane.b32.xlu0 %v6962_v26, %s8824_s9  ;;  %v6584_v26 = vsel %vm269_vm0, %v9799_v20, -inf }
 0x3e4   : > { %7006 = vrot.lane.b32.xlu1 %v6939_v56, %s8824_s9  ;;  %7022 = vrot.lane.b32.xlu0 %v6947_v15, %s8824_s9 }
 0x3e8   : > { %7038 = vrot.lane.b32.xlu1 %v6955_v31, %s8824_s9  ;;  %7054 = vrot.lane.b32.xlu0 %v6963_v38, %s8824_s9 }
 0x3ec   : > { %7008 = vrot.lane.b32.xlu1 %v6940_v52, %s8824_s9  ;;  %7024 = vrot.lane.b32.xlu0 %v6948_v14, %s8824_s9 }
 0x3f0   : > { %7040 = vrot.lane.b32.xlu1 %v6956_v32, %s8824_s9  ;;  %7056 = vrot.lane.b32.xlu0 %v6964_v40, %s8824_s9 }
 0x3f4   : > { %7010 = vrot.lane.b32.xlu1 %v6941_v5, %s8824_s9  ;;  %7026 = vrot.lane.b32.xlu0 %v6949_v17, %s8824_s9 }
 0x3f8   : > { %7042 = vrot.lane.b32.xlu1 %v6957_v23, %s8824_s9  ;;  %7058 = vrot.lane.b32.xlu0 %v6965_v41, %s8824_s9 }
 0x3fc   : > { %7012 = vrot.lane.b32.xlu1 %v6942_v9, %s8824_s9  ;;  %7028 = vrot.lane.b32.xlu0 %v6950_v30, %s8824_s9 }
 0x400   : > { %7044 = vrot.lane.b32.xlu1 %v6958_v22, %s8824_s9  ;;  %7060 = vrot.lane.b32.xlu0 %v6966_v42, %s8824_s9 }
 0x404   : > { %7014 = vrot.lane.b32.xlu1 %v6943_v10, %s8824_s9  ;;  %7030 = vrot.lane.b32.xlu0 %v6951_v19, %s8824_s9 }
 0x408   : > { %7046 = vrot.lane.b32.xlu1 %v6959_v35, %s8824_s9  ;;  %7062 = vrot.lane.b32.xlu0 %v6967_v45, %s8824_s9 }
 0x43e   : > { %v7003_v63 = vpop.permute.xlu1 %7002  ;;  %v7001_v57 = vpop.permute.xlu0 %7000 }
 0x43f   : > { %v7099_v8 = vsel %vm269_vm0, %v7003_v63, 0.0  ;;  %v7096_v18 = vsel %vm269_vm0, %v7001_v57, 0.0 }
 0x440   : > { %7100 = vadd.xlane.f32.xlu1 %v7099_v8  ;;  %7097 = vadd.xlane.f32.xlu0 %v7096_v18 }
 0x442   : > { %v7017_v3 = vpop.permute.xlu1 %7016  ;;  %v7019_v7 = vpop.permute.xlu0 %7018 }
 0x443   : > { %v7120_v4 = vsel %vm269_vm0, %v7017_v3, 0.0  ;;  %v7123_v27 = vsel %vm269_vm0, %v7019_v7, 0.0 }
 0x444   : > { %7121 = vadd.xlane.f32.xlu0 %v7120_v4  ;;  %7124 = vadd.xlane.f32.xlu1 %v7123_v27 }
 0x446   : > { %v7033_v44 = vpop.permute.xlu1 %7032  ;;  %v7035_v12 = vpop.permute.xlu0 %7034 }
 0x447   : > { %v7144_v58 = vsel %vm269_vm0, %v7033_v44, 0.0  ;;  %v7147_v55 = vsel %vm269_vm0, %v7035_v12, 0.0 }
 0x448   : > { %7145 = vadd.xlane.f32.xlu0 %v7144_v58  ;;  %7148 = vadd.xlane.f32.xlu1 %v7147_v55 }
 0x44a   : > { %v7049_v28 = vpop.permute.xlu1 %7048  ;;  %v7051_v33 = vpop.permute.xlu0 %7050 }
 0x44b   : > { %v7168_v54 = vsel %vm269_vm0, %v7049_v28, 0.0  ;;  %v7171_v49 = vsel %vm269_vm0, %v7051_v33, 0.0 }
 0x44c   : > { %7169 = vadd.xlane.f32.xlu0 %v7168_v54  ;;  %7172 = vadd.xlane.f32.xlu1 %v7171_v49 }
 0x44e   : > { %v7005_v47 = vpop.permute.xlu1 %7004  ;;  %v7021_v51 = vpop.permute.xlu0 %7020 }
 0x44f   : > { %v7102_v2 = vsel %vm269_vm0, %v7005_v47, 0.0  ;;  %v7126_v6 = vsel %vm269_vm0, %v7021_v51, 0.0 }
 0x450   : > { %v4460_v25 = vpop.f32.mrb[52].mxu0  ;;  %7103 = vadd.xlane.f32.xlu0 %v7102_v2  ;;  %7127 = vadd.xlane.f32.xlu1 %v7126_v6 }
 0x451   : > { %v8535_v43 = vpop.f32.mrb[53].mxu0  ;;  %v9803_v24 = vmul.f32 0.125, %v4460_v25 }
 0x452   : > { %v7037_v46 = vpop.permute.xlu1 %7036  ;;  %v7053_v60 = vpop.permute.xlu0 %7052 }
 0x453   : > { %v7150_v29 = vsel %vm269_vm0, %v7037_v46, 0.0  ;;  %v7174_v50 = vsel %vm269_vm0, %v7053_v60, 0.0  ;;  %v6587_v21 = vsel %vm269_vm0, %v9803_v24, -inf }
 0x454   : > { %v4537_v36 = vpop.f32.mrb[52].mxu1  ;;  %7151 = vadd.xlane.f32.xlu0 %v7150_v29  ;;  %7175 = vadd.xlane.f32.xlu1 %v7174_v50 }
 0x455   : > { %v8540_v39 = vpop.f32.mrb[53].mxu1  ;;  %v9807_v31 = vmul.f32 0.125, %v4537_v36 }
 0x456   : > { %v7023_v36 = vpop.permute.xlu0 %7022 }
 0x457   : > { %v6590_v40 = vsel %vm269_vm0, %v9807_v31, -inf }
 0x458   : > { %v4614_v37 = vpop.f32.mrb[54].mxu0  ;;  %6579 = vmax.xlane.f32.xlu0 %v6578_v11  ;;  %6576 = vmax.xlane.f32.xlu1 %v6575_v48 }
 0x459   : > { %v8545_v16 = vpop.f32.mrb[55].mxu0  ;;  %v9813_v32 = vmul.f32 0.125, %v4614_v37 }
 0x45b   : > { %v6593_v30 = vsel %vm269_vm0, %v9813_v32, -inf }
 0x45c   : > { %v4691_v53 = vpop.f32.mrb[54].mxu1  ;;  %6582 = vmax.xlane.f32.xlu0 %v6581_v59 }
 0x45d   : > { %v8550_v34 = vpop.f32.mrb[55].mxu1  ;;  %v9821_v9 = vmul.f32 0.125, %v4691_v53 }
 0x45f   : > { %v6596_v35 = vsel %vm269_vm0, %v9821_v9, -inf }
 0x460   : > { %v4768_v56 = vpop.f32.mrb[56].mxu0  ;;  %6585 = vmax.xlane.f32.xlu0 %v6584_v26 }
 0x461   : > { %v8555_v15 = vpop.f32.mrb[57].mxu0  ;;  %v9829_v61 = vmul.f32 0.125, %v4768_v56  ;;  %v7129_v56 = vsel %vm269_vm0, %v7023_v36, 0.0 }
 0x463   : > { %v6599_v8 = vsel %vm269_vm0, %v9829_v61, -inf }
 0x464   : > { %v4845_v38 = vpop.f32.mrb[56].mxu1  ;;  %6588 = vmax.xlane.f32.xlu0 %v6587_v21 }
 0x465   : > { %v9811_v52 = vmul.f32 0.125, %v4845_v38  ;;  %v8560_v14 = vpop.f32.mrb[57].mxu1 }
 0x467   : > { %v6602_v5 = vsel %vm269_vm0, %v9811_v52, -inf }
 0x468   : > { %v4922_v17 = vpop.f32.mrb[58].mxu0  ;;  %6591 = vmax.xlane.f32.xlu0 %v6590_v40  ;;  %6603 = vmax.xlane.f32.xlu1 %v6602_v5 }
 0x469   : > { %v9819_v23 = vmul.f32 0.125, %v4922_v17  ;;  %v8565_v41 = vpop.f32.mrb[59].mxu0 }
 0x46b   : > { %v6605_v22 = vsel %vm269_vm0, %v9819_v23, -inf }
 0x46c   : > { %v4999_v42 = vpop.f32.mrb[58].mxu1  ;;  %6594 = vmax.xlane.f32.xlu0 %v6593_v30  ;;  %6606 = vmax.xlane.f32.xlu1 %v6605_v22 }
 0x46d   : > { %v9827_v10 = vmul.f32 0.125, %v4999_v42  ;;  %v8570_v19 = vpop.f32.mrb[59].mxu1 }
 0x46f   : > { %v6608_v62 = vsel %vm269_vm0, %v9827_v10, -inf }
 0x470   : > { %v5076_v45 = vpop.f32.mrb[60].mxu0  ;;  %6597 = vmax.xlane.f32.xlu0 %v6596_v35  ;;  %6609 = vmax.xlane.f32.xlu1 %v6608_v62  ;;  %v7007_v35 = vpop.permute.xlu1 %7006 }
 0x471   : > { %v9835_v63 = vmul.f32 0.125, %v5076_v45  ;;  %v8575_v57 = vpop.f32.mrb[61].mxu0 }
 0x473   : > { %v6611_v18 = vsel %vm269_vm0, %v9835_v63, -inf }
 0x474   : > { %v5153_v3 = vpop.f32.mrb[60].mxu1  ;;  %6600 = vmax.xlane.f32.xlu0 %v6599_v8  ;;  %6612 = vmax.xlane.f32.xlu1 %v6611_v18 }
 0x475   : > { %v9841_v7 = vmul.f32 0.125, %v5153_v3  ;;  %v8580_v4 = vpop.f32.mrb[61].mxu1 }
 0x477   : > { %v6614_v27 = vsel %vm269_vm0, %v9841_v7, -inf }
 0x478   : > { %v5230_v44 = vpop.f32.mrb[62].mxu0  ;;  %6615 = vmax.xlane.f32.xlu1 %v6614_v27 }
 0x479   : > { %v9845_v12 = vmul.f32 0.125, %v5230_v44  ;;  %v8585_v58 = vpop.f32.mrb[63].mxu0 }
 0x47b   : > { %v6617_v55 = vsel %vm269_vm0, %v9845_v12, -inf }
 0x47c   : > { %v5307_v28 = vpop.f32.mrb[62].mxu1  ;;  %v5384_v33 = vpop.f32.mrb[64].mxu0  ;;  %6618 = vmax.xlane.f32.xlu1 %v6617_v55 }
 0x47d   : > { %v9849_v54 = vmul.f32 0.125, %v5307_v28  ;;  %v9851_v49 = vmul.f32 0.125, %v5384_v33  ;;  %v8590_v47 = vpop.f32.mrb[63].mxu1  ;;  %v8595_v51 = vpop.f32.mrb[65].mxu0 }
 0x47e   : > { %v7039_v28 = vpop.permute.xlu1 %7038  ;;  %v7055_v33 = vpop.permute.xlu0 %7054 }
 0x47f   : > { %v6623_v2 = vsel %vm269_vm0, %v9851_v49, -inf  ;;  %v6620_v6 = vsel %vm269_vm0, %v9849_v54, -inf }
 0x480   : > { %v5461_v25 = vpop.f32.mrb[64].mxu1  ;;  %v5538_v43 = vpop.f32.mrb[66].mxu0  ;;  %6624 = vmax.xlane.f32.xlu0 %v6623_v2  ;;  %6621 = vmax.xlane.f32.xlu1 %v6620_v6 }
 0x481   : > { %v9857_v46 = vmul.f32 0.125, %v5461_v25  ;;  %v9859_v60 = vmul.f32 0.125, %v5538_v43  ;;  %v8600_v29 = vpop.f32.mrb[65].mxu1  ;;  %v8605_v50 = vpop.f32.mrb[67].mxu0 }
 0x483   : > { %v6629_v39 = vsel %vm269_vm0, %v9859_v60, -inf  ;;  %v6626_v11 = vsel %vm269_vm0, %v9857_v46, -inf }
 0x484   : > { %v5615_v48 = vpop.f32.mrb[66].mxu1  ;;  %v5692_v37 = vpop.f32.mrb[68].mxu0  ;;  %6630 = vmax.xlane.f32.xlu0 %v6629_v39  ;;  %6627 = vmax.xlane.f32.xlu1 %v6626_v11  ;;  %v7105_v39 = vsel %vm269_vm0, %v7007_v35, 0.0 }
 0x485   : > { %v9865_v16 = vmul.f32 0.125, %v5615_v48  ;;  %v8610_v59 = vpop.f32.mrb[67].mxu1  ;;  %v8615_v53 = vpop.f32.mrb[69].mxu0  ;;  %v9867_v34 = vmul.f32 0.125, %v5692_v37 }
 0x487   : > { %v6632_v26 = vsel %vm269_vm0, %v9865_v16, -inf  ;;  %v6635_v5 = vsel %vm269_vm0, %v9867_v34, -inf }
 0x488   : > { %v5769_v15 = vpop.f32.mrb[68].mxu1  ;;  %6633 = vmax.xlane.f32.xlu0 %v6632_v26  ;;  %7130 = vadd.xlane.f32.xlu1 %v7129_v56  ;;  %v7009_v26 = vpop.permute.xlu1 %7008 }
 0x489   : > { %v5846_v21 = vpop.f32.mrb[70].mxu0  ;;  %v8620_v38 = vpop.f32.mrb[69].mxu1  ;;  %v9872_v40 = vmul.f32 0.125, %v5769_v15 }
 0x48a   : > { %v8625_v14 = vpop.f32.mrb[71].mxu0  ;;  %v9876_v42 = vmul.f32 0.125, %v5846_v21  ;;  %v7025_v56 = vpop.permute.xlu0 %7024 }
 0x48b   : > { %v6638_v19 = vsel %vm269_vm0, %v9872_v40, -inf }
 0x48c   : > { %v5923_v17 = vpop.f32.mrb[70].mxu1  ;;  %6636 = vmax.xlane.f32.xlu0 %v6635_v5  ;;  %v6641_v27 = vsel %vm269_vm0, %v9876_v42, -inf  ;;  %v7153_v5 = vsel %vm269_vm0, %v7039_v28, 0.0 }
 0x48d   : > { %v6000_v41 = vpop.f32.mrb[72].mxu0  ;;  %v8630_v30 = vpop.f32.mrb[71].mxu1  ;;  %v9896_v50 = vmul.f32 0.125, %v5923_v17 }
 0x48e   : > { %v8635_v22 = vpop.f32.mrb[73].mxu0  ;;  %v9882_v3 = vmul.f32 0.125, %v6000_v41  ;;  %v7041_v41 = vpop.permute.xlu1 %7040 }
 0x48f   : > { %v6644_v21 = vsel %vm269_vm0, %v9896_v50, -inf  ;;  %v7057_v30 = vpop.permute.xlu0 %7056 }
 0x490   : > { %v6077_v62 = vpop.f32.mrb[72].mxu1  ;;  %6639 = vmax.xlane.f32.xlu0 %v6638_v19  ;;  %v6647_v51 = vsel %vm269_vm0, %v9882_v3, -inf  ;;  %v7108_v19 = vsel %vm269_vm0, %v7009_v26, 0.0 }
 0x491   : > { %v9880_v45 = vmul.f32 0.125, %v6077_v62  ;;  %v6154_v57 = vpop.f32.mrb[74].mxu0  ;;  %v8640_v8 = vpop.f32.mrb[73].mxu1 }
 0x492   : > { %v8645_v18 = vpop.f32.mrb[75].mxu0  ;;  %v9884_v4 = vmul.f32 0.125, %v6154_v57  ;;  %v7011_v62 = vpop.permute.xlu1 %7010  ;;  %v7156_v8 = vsel %vm269_vm0, %v7041_v41, 0.0 }
 0x493   : > { %v6650_v44 = vsel %vm269_vm0, %v9880_v45, -inf  ;;  %v7027_v57 = vpop.permute.xlu0 %7026 }
 0x494   : > { %v6231_v58 = vpop.f32.mrb[74].mxu1  ;;  %6642 = vmax.xlane.f32.xlu0 %v6641_v27  ;;  %6651 = vmax.xlane.f32.xlu1 %v6650_v44  ;;  %v6653_v2 = vsel %vm269_vm0, %v9884_v4, -inf  ;;  %v7111_v27 = vsel %vm269_vm0, %v7011_v62, 0.0  ;;  %v7177_v44 = vsel %vm269_vm0, %v7055_v33, 0.0 }
 0x495   : > { %v8650_v55 = vpop.f32.mrb[75].mxu1  ;;  %v9890_v47 = vmul.f32 0.125, %v6231_v58 }
 0x496   : > { %v7043_v58 = vpop.permute.xlu1 %7042 }
 0x497   : > { %v6656_v11 = vsel %vm269_vm0, %v9890_v47, -inf  ;;  %v7059_v55 = vpop.permute.xlu0 %7058  ;;  %v7159_v28 = vsel %vm269_vm0, %v7043_v58, 0.0 }
 0x498   : > { %v6308_v6 = vpop.f32.mrb[76].mxu0  ;;  %v6385_v25 = vpop.f32.mrb[76].mxu1  ;;  %6648 = vmax.xlane.f32.xlu0 %v6647_v51  ;;  %6654 = vmax.xlane.f32.xlu1 %v6653_v2  ;;  %v7132_v51 = vsel %vm269_vm0, %v7025_v56, 0.0 }
 0x499   : > { %v8655_v43 = vpop.f32.mrb[77].mxu0  ;;  %v8660_v29 = vpop.f32.mrb[77].mxu1  ;;  %v9898_v36 = vmul.f32 0.125, %v6308_v6  ;;  %v9903_v15 = vmul.f32 0.125, %v6385_v25  ;;  %v7180_v25 = vsel %vm269_vm0, %v7057_v30, 0.0 }
 0x49a   : > { %v9926_v2 = vpop.permute.xlu1 %7012  ;;  %v7135_v43 = vsel %vm269_vm0, %v7027_v57, 0.0 }
 0x49b   : > { %v6659_v38 = vsel %vm269_vm0, %v9898_v36, -inf  ;;  %v6662_v17 = vsel %vm269_vm0, %v9903_v15, -inf  ;;  %v9928_v6 = vpop.permute.xlu0 %7028 }
 0x49c   : > { %v6462_v48 = vpop.f32.mrb[78].mxu0  ;;  %v6539_v37 = vpop.f32.mrb[78].mxu1  ;;  %7106 = vadd.xlane.f32.xlu0 %v7105_v39  ;;  %6657 = vmax.xlane.f32.xlu1 %v6656_v11  ;;  %v7183_v39 = vsel %vm269_vm0, %v7059_v55, 0.0 }
 0x49d   : > { %v8665_v59 = vpop.f32.mrb[79].mxu0  ;;  %v8670_v53 = vpop.f32.mrb[79].mxu1  ;;  %v9909_v14 = vmul.f32 0.125, %v6462_v48  ;;  %v9914_v22 = vmul.f32 0.125, %v6539_v37 }
 0x49e   : > { %v9932_v33 = vpop.permute.xlu1 %7044 }
 0x49f   : > { %v6665_v35 = vsel %vm269_vm0, %v9909_v14, -inf  ;;  %v6668_v18 = vsel %vm269_vm0, %v9914_v22, -inf  ;;  %v9934_v29 = vpop.permute.xlu0 %7060 }
 0x4a0   : > { %6645 = vmax.xlane.f32.xlu0 %v6644_v21  ;;  %6660 = vmax.xlane.f32.xlu1 %v6659_v38 }
 0x4a2   : > { %v9937_v11 = vpop.permute.xlu1 %7014 }
 0x4a3   : > { %v9939_v48 = vpop.permute.xlu0 %7030 }
 0x4a4   : > { %7154 = vadd.xlane.f32.xlu0 %v7153_v5  ;;  %6663 = vmax.xlane.f32.xlu1 %v6662_v17 }
 0x4a6   : > { %v9941_v37 = vpop.permute.xlu1 %7046 }
 0x4a7   : > { %v9943_v59 = vpop.permute.xlu0 %7062 }
 0x4a8   : > { %7109 = vadd.xlane.f32.xlu0 %v7108_v19  ;;  %6666 = vmax.xlane.f32.xlu1 %v6665_v35 }
 0x4ac   : > { %7157 = vadd.xlane.f32.xlu0 %v7156_v8  ;;  %6669 = vmax.xlane.f32.xlu1 %v6668_v18 }
 0x4b0   : > { %7112 = vadd.xlane.f32.xlu0 %v7111_v27  ;;  %7178 = vadd.xlane.f32.xlu1 %v7177_v44 }
 0x4b4   : > { %7160 = vadd.xlane.f32.xlu0 %v7159_v28  ;;  %7133 = vadd.xlane.f32.xlu1 %v7132_v51 }
 0x4b8   : > { %7181 = vadd.xlane.f32.xlu1 %v7180_v25 }
 0x4bc   : > { %7136 = vadd.xlane.f32.xlu1 %v7135_v43 }
 0x4c0   : > { %7184 = vadd.xlane.f32.xlu1 %v7183_v39 }
 0x4cd   : > { %v9945_v53 = vpop.xlane.xlu1 %7100  ;;  %v9947_v26 = vpop.xlane.xlu0 %7097 }
 0x4d1   : > { %v9949_v56 = vpop.xlane.xlu1 %7124  ;;  %v9951_v21 = vpop.xlane.xlu0 %7121 }
 0x4d5   : > { %v9953_v38 = vpop.xlane.xlu1 %7148  ;;  %v9955_v5 = vpop.xlane.xlu0 %7145 }
 0x4d9   : > { %v9957_v17 = vpop.xlane.xlu1 %7172  ;;  %v9959_v41 = vpop.xlane.xlu0 %7169 }
 0x4da   : > { %10433 = vst [vmem:[#allocation3_spill] sm:$0xff] %v9959_v41 }
 0x4dd   : > { %v9961_v30 = vpop.xlane.xlu1 %7127  ;;  %v9963_v19 = vpop.xlane.xlu0 %7103 }
 0x4e1   : > { %v9965_v35 = vpop.xlane.xlu1 %7175  ;;  %v9967_v62 = vpop.xlane.xlu0 %7151 }
 0x4e2   : > { %10434 = vst [vmem:[#allocation4_spill] sm:$0xff] %v9965_v35 }
 0x4e5   : > { %v6577_v57 = vpop.xlane.xlu1 %6576  ;;  %v6580_v8 = vpop.xlane.xlu0 %6579 }
 0x4e6   : > { %v6671_v18 = vsub.f32 %v9787_v0, %v6577_v57  ;;  %v6672_v27 = vsub.f32 %v9784_v1, %v6580_v8 }
 0x4e8   : > { %v6703_v44 = vmul.f32 1.442695, %v6671_v18  ;;  %v6705_v58 = vmul.f32 1.442695, %v6672_v27 }
 0x4e9   : > { %v6583_v55 = vpop.xlane.xlu0 %6582 }
 0x4ea   : > { %8684 = vpow2.f32 %v6703_v44  ;;  %v6673_v28 = vsub.f32 %v9792_v13, %v6583_v55 }
 0x4eb   : > { %8686 = vpow2.f32 %v6705_v58 }
 0x4ec   : > { %v6707_v51 = vmul.f32 1.442695, %v6673_v28 }
 0x4ed   : > { %v6586_v25 = vpop.xlane.xlu0 %6585 }
 0x4ee   : > { %8688 = vpow2.f32 %v6707_v51  ;;  %v6674_v43 = vsub.f32 %v9799_v20, %v6586_v25 }
 0x4f0   : > { %v6709_v39 = vmul.f32 1.442695, %v6674_v43 }
 0x4f1   : > { %v6589_v41 = vpop.xlane.xlu0 %6588 }
 0x4f2   : > { %8690 = vpow2.f32 %v6709_v39  ;;  %v6675_v35 = vsub.f32 %v9803_v24, %v6589_v41 }
 0x4f4   : > { %v9974_v0 = vpop.eup %8684  ;;  %v6711_v1 = vmul.f32 1.442695, %v6675_v35 }
 0x4f5   : > { %v9976_v57 = vpop.eup %8686  ;;  %v6604_v8 = vpop.xlane.xlu1 %6603  ;;  %v6767_v13 = vsel %vm269_vm0, %v9974_v0, 0.0 }
 0x4f6   : > { %v6592_v18 = vpop.xlane.xlu0 %6591  ;;  %8692 = vpow2.f32 %v6711_v1  ;;  %v6680_v27 = vsub.f32 %v9811_v52, %v6604_v8  ;;  %6768 = vadd.xlane.f32.xlu1 %v6767_v13  ;;  %v6770_v44 = vsel %vm269_vm0, %v9976_v57, 0.0 }
 0x4f7   : > { %v6676_v20 = vsub.f32 %v9807_v31, %v6592_v18  ;;  %6771 = vadd.xlane.f32.xlu0 %v6770_v44 }
 0x4f8   : > { %v9984_v24 = vpop.eup %8688  ;;  %v6721_v41 = vmul.f32 1.442695, %v6680_v27 }
 0x4f9   : > { %v6713_v35 = vmul.f32 1.442695, %v6676_v20  ;;  %v6607_v58 = vpop.xlane.xlu1 %6606  ;;  %v6773_v28 = vsel %vm269_vm0, %v9984_v24, 0.0 }
 0x4fa   : > { %v6595_v55 = vpop.xlane.xlu0 %6594  ;;  %8694 = vpow2.f32 %v6721_v41  ;;  %v6681_v51 = vsub.f32 %v9819_v23, %v6607_v58 }
 0x4fb   : > { %v6677_v52 = vsub.f32 %v9813_v32, %v6595_v55  ;;  %8696 = vpow2.f32 %v6713_v35  ;;  %6774 = vadd.xlane.f32.xlu0 %v6773_v28 }
 0x4fc   : > { %v9990_v31 = vpop.eup %8690  ;;  %v6723_v25 = vmul.f32 1.442695, %v6681_v51 }
 0x4fd   : > { %v6715_v43 = vmul.f32 1.442695, %v6677_v52  ;;  %v6610_v39 = vpop.xlane.xlu1 %6609  ;;  %v6776_v8 = vsel %vm269_vm0, %v9990_v31, 0.0 }
 0x4fe   : > { %v6598_v1 = vpop.xlane.xlu0 %6597  ;;  %8698 = vpow2.f32 %v6723_v25  ;;  %v6682_v18 = vsub.f32 %v9827_v10, %v6610_v39 }
 0x4ff   : > { %v6678_v13 = vsub.f32 %v9821_v9, %v6598_v1  ;;  %8700 = vpow2.f32 %v6715_v43  ;;  %6777 = vadd.xlane.f32.xlu0 %v6776_v8 }
 0x500   : > { %v9996_v23 = vpop.eup %8692  ;;  %v6725_v32 = vmul.f32 1.442695, %v6682_v18 }
 0x501   : > { %v6717_v27 = vmul.f32 1.442695, %v6678_v13  ;;  %v6613_v20 = vpop.xlane.xlu1 %6612  ;;  %v6779_v41 = vsel %vm269_vm0, %v9996_v23, 0.0 }
 0x502   : > { %v6601_v44 = vpop.xlane.xlu0 %6600  ;;  %8702 = vpow2.f32 %v6725_v32  ;;  %v6683_v35 = vsub.f32 %v9835_v63, %v6613_v20 }
 0x503   : > { %v6679_v58 = vsub.f32 %v9829_v61, %v6601_v44  ;;  %8704 = vpow2.f32 %v6717_v27  ;;  %6780 = vadd.xlane.f32.xlu0 %v6779_v41 }
 0x504   : > { %v10002_v10 = vpop.eup %8694  ;;  %v6727_v9 = vmul.f32 1.442695, %v6683_v35 }
 0x505   : > { %v6719_v55 = vmul.f32 1.442695, %v6679_v58  ;;  %v10004_v28 = vpop.eup %8696  ;;  %v6616_v51 = vpop.xlane.xlu1 %6615  ;;  %v6794_v52 = vsel %vm269_vm0, %v10002_v10, 0.0 }
 0x506   : > { %8706 = vpow2.f32 %v6727_v9  ;;  %v6684_v25 = vsub.f32 %v9841_v7, %v6616_v51  ;;  %6795 = vadd.xlane.f32.xlu1 %v6794_v52  ;;  %v6782_v63 = vsel %vm269_vm0, %v10004_v28, 0.0 }
 0x507   : > { %8708 = vpow2.f32 %v6719_v55  ;;  %6783 = vadd.xlane.f32.xlu0 %v6782_v63 }
 0x508   : > { %v10011_v61 = vpop.eup %8698  ;;  %v6729_v43 = vmul.f32 1.442695, %v6684_v25 }
 0x509   : > { %v10013_v39 = vpop.eup %8700  ;;  %v6619_v1 = vpop.xlane.xlu1 %6618  ;;  %v6797_v8 = vsel %vm269_vm0, %v10011_v61, 0.0 }
 0x50a   : > { %8710 = vpow2.f32 %v6729_v43  ;;  %v6685_v18 = vsub.f32 %v9845_v12, %v6619_v1  ;;  %6798 = vadd.xlane.f32.xlu1 %v6797_v8  ;;  %v6785_v7 = vsel %vm269_vm0, %v10013_v39, 0.0 }
 0x50b   : > { %6786 = vadd.xlane.f32.xlu0 %v6785_v7 }
 0x50c   : > { %v10020_v13 = vpop.eup %8702  ;;  %v6731_v32 = vmul.f32 1.442695, %v6685_v18 }
 0x50d   : > { %v10022_v27 = vpop.eup %8704  ;;  %v6622_v20 = vpop.xlane.xlu1 %6621  ;;  %v6800_v41 = vsel %vm269_vm0, %v10020_v13, 0.0 }
 0x50e   : > { %v6625_v44 = vpop.xlane.xlu0 %6624  ;;  %8712 = vpow2.f32 %v6731_v32  ;;  %v6686_v35 = vsub.f32 %v9849_v54, %v6622_v20  ;;  %6801 = vadd.xlane.f32.xlu1 %v6800_v41  ;;  %v6788_v58 = vsel %vm269_vm0, %v10022_v27, 0.0 }
 0x50f   : > { %v6687_v12 = vsub.f32 %v9851_v49, %v6625_v44  ;;  %6789 = vadd.xlane.f32.xlu0 %v6788_v58 }
 0x510   : > { %v10030_v9 = vpop.eup %8706  ;;  %v6733_v55 = vmul.f32 1.442695, %v6686_v35 }
 0x511   : > { %v6735_v51 = vmul.f32 1.442695, %v6687_v12  ;;  %v10032_v52 = vpop.eup %8708  ;;  %v6628_v25 = vpop.xlane.xlu1 %6627  ;;  %v6803_v43 = vsel %vm269_vm0, %v10030_v9, 0.0 }
 0x512   : > { %v6631_v63 = vpop.xlane.xlu0 %6630  ;;  %8714 = vpow2.f32 %v6733_v55  ;;  %v6688_v54 = vsub.f32 %v9857_v46, %v6628_v25  ;;  %6804 = vadd.xlane.f32.xlu1 %v6803_v43  ;;  %v6791_v1 = vsel %vm269_vm0, %v10032_v52, 0.0 }
 0x513   : > { %v6689_v49 = vsub.f32 %v9859_v60, %v6631_v63  ;;  %8716 = vpow2.f32 %v6735_v51  ;;  %6792 = vadd.xlane.f32.xlu0 %v6791_v1 }
 0x514   : > { %v10040_v8 = vpop.eup %8710  ;;  %v6737_v18 = vmul.f32 1.442695, %v6688_v54 }
 0x515   : > { %v6739_v7 = vmul.f32 1.442695, %v6689_v49  ;;  %v6806_v20 = vsel %vm269_vm0, %v10040_v8, 0.0  ;;  %v10054_v25 = vpop.xlane.xlu1 %7130 }
 0x516   : > { %v6634_v32 = vpop.xlane.xlu0 %6633  ;;  %8718 = vpow2.f32 %v6737_v18  ;;  %6807 = vadd.xlane.f32.xlu1 %v6806_v20 }
 0x517   : > { %v6690_v44 = vsub.f32 %v9865_v16, %v6634_v32  ;;  %8720 = vpow2.f32 %v6739_v7 }
 0x518   : > { %v10045_v46 = vpop.eup %8712 }
 0x519   : > { %v6741_v60 = vmul.f32 1.442695, %v6690_v44  ;;  %v6809_v35 = vsel %vm269_vm0, %v10045_v46, 0.0 }
 0x51a   : > { %v6637_v41 = vpop.xlane.xlu0 %6636  ;;  %6810 = vadd.xlane.f32.xlu1 %v6809_v35 }
 0x51b   : > { %8722 = vpow2.f32 %v6741_v60  ;;  %v6691_v12 = vsub.f32 %v9867_v34, %v6637_v41 }
 0x51c   : > { %v10050_v58 = vpop.eup %8714 }
 0x51d   : > { %v6743_v55 = vmul.f32 1.442695, %v6691_v12  ;;  %v10052_v51 = vpop.eup %8716  ;;  %v6812_v63 = vsel %vm269_vm0, %v10050_v58, 0.0 }
 0x51e   : > { %v6640_v16 = vpop.xlane.xlu0 %6639  ;;  %6813 = vadd.xlane.f32.xlu1 %v6812_v63  ;;  %v6815_v54 = vsel %vm269_vm0, %v10052_v51, 0.0 }
 0x51f   : > { %8724 = vpow2.f32 %v6743_v55  ;;  %v6692_v43 = vsub.f32 %v9872_v40, %v6640_v16  ;;  %6816 = vadd.xlane.f32.xlu0 %v6815_v54  ;;  %v7138_v16 = vsel %vm269_vm0, %v9928_v6, 0.0 }
 0x520   : > { %v10061_v34 = vpop.eup %8718 }
 0x521   : > { %v6745_v49 = vmul.f32 1.442695, %v6692_v43  ;;  %v10063_v1 = vpop.eup %8720  ;;  %v6652_v18 = vpop.xlane.xlu1 %6651  ;;  %v6818_v32 = vsel %vm269_vm0, %v10061_v34, 0.0 }
 0x522   : > { %v6643_v7 = vpop.xlane.xlu0 %6642  ;;  %v6696_v20 = vsub.f32 %v9880_v45, %v6652_v18  ;;  %6819 = vadd.xlane.f32.xlu1 %v6818_v32  ;;  %v6821_v44 = vsel %vm269_vm0, %v10063_v1, 0.0 }
 0x523   : > { %8726 = vpow2.f32 %v6745_v49  ;;  %v6693_v40 = vsub.f32 %v9876_v42, %v6643_v7  ;;  %6822 = vadd.xlane.f32.xlu0 %v6821_v44 }
 0x524   : > { %v6753_v41 = vmul.f32 1.442695, %v6696_v20 }
 0x525   : > { %v10071_v60 = vpop.eup %8722  ;;  %v6747_v35 = vmul.f32 1.442695, %v6693_v40  ;;  %v6655_v12 = vpop.xlane.xlu1 %6654 }
 0x526   : > { %v6649_v55 = vpop.xlane.xlu0 %6648  ;;  %v6824_v63 = vsel %vm269_vm0, %v10071_v60, 0.0  ;;  %8728 = vpow2.f32 %v6753_v41  ;;  %v6697_v42 = vsub.f32 %v9884_v4, %v6655_v12  ;;  %7139 = vadd.xlane.f32.xlu1 %v7138_v16 }
 0x527   : > { %v6695_v45 = vsub.f32 %v9882_v3, %v6649_v55  ;;  %8730 = vpow2.f32 %v6747_v35  ;;  %6825 = vadd.xlane.f32.xlu0 %v6824_v63 }
 0x528   : > { %v6755_v54 = vmul.f32 1.442695, %v6697_v42 }
 0x529   : > { %v10079_v43 = vpop.eup %8724  ;;  %v6751_v49 = vmul.f32 1.442695, %v6695_v45  ;;  %v6658_v18 = vpop.xlane.xlu1 %6657 }
 0x52a   : > { %v10081_v7 = vpop.xlane.xlu0 %7106  ;;  %v6827_v6 = vsel %vm269_vm0, %v10079_v43, 0.0  ;;  %8732 = vpow2.f32 %v6755_v54  ;;  %v6698_v32 = vsub.f32 %v9890_v47, %v6658_v18 }
 0x52b   : > { %8734 = vpow2.f32 %v6751_v49  ;;  %6828 = vadd.xlane.f32.xlu0 %v6827_v6 }
 0x52c   : > { %v6757_v3 = vmul.f32 1.442695, %v6698_v32 }
 0x52d   : > { %v10086_v4 = vpop.eup %8726  ;;  %v6661_v20 = vpop.xlane.xlu1 %6660 }
 0x52e   : > { %v6646_v40 = vpop.xlane.xlu0 %6645  ;;  %v6830_v44 = vsel %vm269_vm0, %v10086_v4, 0.0  ;;  %8736 = vpow2.f32 %v6757_v3  ;;  %v6699_v41 = vsub.f32 %v9898_v36, %v6661_v20 }
 0x52f   : > { %v6694_v35 = vsub.f32 %v9896_v50, %v6646_v40  ;;  %6831 = vadd.xlane.f32.xlu0 %v6830_v44 }
 0x530   : > { %v10092_v12 = vpop.eup %8728  ;;  %v6759_v55 = vmul.f32 1.442695, %v6699_v41 }
 0x531   : > { %v6749_v47 = vmul.f32 1.442695, %v6694_v35  ;;  %v10094_v16 = vpop.eup %8730  ;;  %v6664_v63 = vpop.xlane.xlu1 %6663  ;;  %v6842_v42 = vsel %vm269_vm0, %v10092_v12, 0.0  ;;  %v7114_v35 = vsel %vm269_vm0, %v9926_v2, 0.0 }
 0x532   : > { %8738 = vpow2.f32 %v6759_v55  ;;  %v6700_v45 = vsub.f32 %v9903_v15, %v6664_v63  ;;  %6843 = vadd.xlane.f32.xlu1 %v6842_v42  ;;  %v6833_v36 = vsel %vm269_vm0, %v10094_v16, 0.0 }
 0x533   : > { %8740 = vpow2.f32 %v6749_v47  ;;  %6834 = vadd.xlane.f32.xlu0 %v6833_v36 }
 0x534   : > { %v10101_v50 = vpop.eup %8732  ;;  %v6761_v54 = vmul.f32 1.442695, %v6700_v45  ;;  %v7162_v45 = vsel %vm269_vm0, %v9932_v33, 0.0  ;;  %v7165_v33 = vsel %vm269_vm0, %v9941_v37, 0.0 }
 0x535   : > { %v10103_v49 = vpop.eup %8734  ;;  %v6667_v18 = vpop.xlane.xlu1 %6666  ;;  %v6845_v6 = vsel %vm269_vm0, %v10101_v50, 0.0 }
 0x536   : > { %8742 = vpow2.f32 %v6761_v54  ;;  %v6701_v32 = vsub.f32 %v9909_v14, %v6667_v18  ;;  %6846 = vadd.xlane.f32.xlu1 %v6845_v6  ;;  %v6839_v15 = vsel %vm269_vm0, %v10103_v49, 0.0  ;;  %v7117_v18 = vsel %vm269_vm0, %v9937_v11, 0.0 }
 0x537   : > { %6840 = vadd.xlane.f32.xlu0 %v6839_v15  ;;  %v7186_v15 = vsel %vm269_vm0, %v9934_v29, 0.0  ;;  %v7189_v11 = vsel %vm269_vm0, %v9943_v59, 0.0  ;;  %v7224_v59 = vlaneseq }
 0x538   : > { %v10110_v3 = vpop.eup %8736  ;;  %v6763_v20 = vmul.f32 1.442695, %v6701_v32 }
 0x539   : > { %v6670_v40 = vpop.xlane.xlu1 %6669  ;;  %v6848_v44 = vsel %vm269_vm0, %v10110_v3, 0.0 }
 0x53a   : > { %8744 = vpow2.f32 %v6763_v20  ;;  %v6702_v41 = vsub.f32 %v9914_v22, %v6670_v40  ;;  %6849 = vadd.xlane.f32.xlu1 %v6848_v44  ;;  %v7141_v20 = vsel %vm269_vm0, %v9939_v48, 0.0  ;;  %v10151_v44 = vpop.xlane.xlu0 %7154 }
 0x53b   : > { %7115 = vadd.xlane.f32.xlu0 %v7114_v35 }
 0x53c   : > { %v10117_v14 = vpop.eup %8738  ;;  %v6765_v55 = vmul.f32 1.442695, %v6702_v41 }
 0x53d   : > { %v10119_v47 = vpop.eup %8740  ;;  %v6851_v63 = vsel %vm269_vm0, %v10117_v14, 0.0  ;;  %v10149_v40 = vpop.xlane.xlu1 %7178 }
 0x53e   : > { %8746 = vpow2.f32 %v6765_v55  ;;  %6852 = vadd.xlane.f32.xlu1 %v6851_v63  ;;  %v6836_v42 = vsel %vm269_vm0, %v10119_v47, 0.0  ;;  %v7110_v37 = vpop.xlane.xlu0 %7109 }
 0x53f   : > { %6837 = vadd.xlane.f32.xlu0 %v6836_v42 }
 0x540   : > { %v10125_v22 = vpop.eup %8742 }
 0x541   : > { %10435 = vst [vmem:[#allocation5_spill] sm:$0xff] %v10125_v22  ;;  %v6854_v2 = vsel %vm269_vm0, %v10125_v22, 0.0  ;;  %v10153_v41 = vpop.xlane.xlu1 %7133 }
 0x542   : > { %6855 = vadd.xlane.f32.xlu1 %v6854_v2  ;;  %v10157_v55 = vpop.xlane.xlu0 %7157 }
 0x543   : > { %7163 = vadd.xlane.f32.xlu0 %v7162_v45 }
 0x544   : > { %v10131_v36 = vpop.eup %8744 }
 0x545   : > { %10436 = vst [vmem:[#allocation6_spill] sm:$0xff] %v10131_v36  ;;  %v6857_v54 = vsel %vm269_vm0, %v10131_v36, 0.0  ;;  %v10155_v35 = vpop.xlane.xlu1 %7181 }
 0x546   : > { %6858 = vadd.xlane.f32.xlu1 %v6857_v54  ;;  %v10161_v63 = vpop.xlane.xlu0 %7112  ;;  %v7225_v54 = vand.u32 127, %v7224_v59 }
 0x547   : > { %7118 = vadd.xlane.f32.xlu0 %v7117_v18  ;;  %v7227_v18 = vshrl.u32 %v7224_v59, 7 }
 0x548   : > { %v10137_v6 = vpop.eup %8746 }
 0x549   : > { %10437 = vst [vmem:[#allocation7_spill] sm:$0xff] %v10137_v6  ;;  %v6860_v32 = vsel %vm269_vm0, %v10137_v6, 0.0  ;;  %v10159_v29 = vpop.xlane.xlu1 %7136 }
 0x54a   : > { %6861 = vadd.xlane.f32.xlu1 %v6860_v32  ;;  %v10165_v42 = vpop.xlane.xlu0 %7160 }
 0x54b   : > { %7166 = vadd.xlane.f32.xlu0 %v7165_v33  ;;  %v10167_v33 = vsub.s32 %v7225_v54, %v7227_v18 }
 0x54d   : > { %v10163_v48 = vpop.xlane.xlu1 %7184  ;;  %v7229_v6 = vrot.slane %v9947_v26, %v10167_v33  ;;  %v7237_v22 = vrot.slane %v9963_v19, %v10167_v33 }
 0x54e   : > { %7187 = vadd.xlane.f32.xlu1 %v7186_v15  ;;  %10438 = vst [vmem:[#allocation8_spill] sm:$0xff] %v10163_v48 }
 0x552   : > { %7142 = vadd.xlane.f32.xlu1 %v7141_v20 }
 0x556   : > { %7190 = vadd.xlane.f32.xlu1 %v7189_v11 }
 0x583   : > { %v6769_v2 = vpop.xlane.xlu1 %6768 }
 0x584   : > { %8748 = vrcp.f32 %v6769_v2  ;;  %v6772_v45 = vpop.xlane.xlu0 %6771  ;;  %v7233_v2 = vrot.slane %v9945_v53, %v10167_v33 }
 0x585   : > { %8750 = vrcp.f32 %v6772_v45 }
 0x588   : > { %v6775_v32 = vpop.xlane.xlu0 %6774 }
 0x589   : > { %8752 = vrcp.f32 %v6775_v32 }
 0x58c   : > { %v6778_v15 = vpop.xlane.xlu0 %6777 }
 0x58d   : > { %8754 = vrcp.f32 %v6778_v15 }
 0x58e   : > { %v8749_v20 = vpop.eup %8748 }
 0x58f   : > { %v8751_v11 = vpop.eup %8750  ;;  %v6895_v36 = vmul.f32 %v8749_v20, %v9974_v0 }
 0x590   : > { %v6781_v48 = vpop.xlane.xlu0 %6780  ;;  %v6896_v45 = vmul.f32 %v8751_v11, %v9976_v57 }
 0x591   : > { %8756 = vrcp.f32 %v6781_v48  ;;  %v7585_v59 = vmul.f32 %v7229_v6, %v6895_v36  ;;  %v7241_v6 = vrot.slane %v10081_v7, %v10167_v33 }
 0x592   : > { %v7586_v32 = vmul.f32 %v7233_v2, %v6896_v45 }
 0x593   : > { %v8753_v54 = vpop.eup %8752  ;;  %v6796_v18 = vpop.xlane.xlu1 %6795  ;;  %v7617_v15 = vsel %vm269_vm0, %v7585_v59, 0.0  ;;  %v7245_v59 = vrot.slane %v7110_v37, %v10167_v33  ;;  %v7249_v37 = vrot.slane %v10161_v63, %v10167_v33 }
 0x594   : > { %8758 = vrcp.f32 %v6796_v18  ;;  %v6784_v26 = vpop.xlane.xlu0 %6783  ;;  %7618 = vadd.xlane.f32.xlu0 %v7617_v15  ;;  %v7620_v0 = vsel %vm269_vm0, %v7586_v32, 0.0  ;;  %v6897_v53 = vmul.f32 %v8753_v54, %v9984_v24 }
 0x595   : > { %8760 = vrcp.f32 %v6784_v26  ;;  %7621 = vadd.xlane.f32.xlu1 %v7620_v0 }
 0x596   : > { %v7587_v57 = vmul.f32 %v7237_v22, %v6897_v53 }
 0x597   : > { %v8755_v48 = vpop.eup %8754  ;;  %v6799_v36 = vpop.xlane.xlu1 %6798 }
 0x598   : > { %8762 = vrcp.f32 %v6799_v36  ;;  %v7623_v20 = vsel %vm269_vm0, %v7587_v57, 0.0  ;;  %v6898_v19 = vmul.f32 %v8755_v48, %v9990_v31  ;;  %v10185_v24 = vpop.xlane.xlu0 %6786  ;;  %v7265_v31 = vrot.slane %v9949_v56, %v10167_v33 }
 0x599   : > { %7624 = vadd.xlane.f32.xlu0 %v7623_v20  ;;  %v7269_v56 = vrot.slane %v9961_v30, %v10167_v33 }
 0x59a   : > { %v7588_v11 = vmul.f32 %v7241_v6, %v6898_v19 }
 0x59b   : > { %v8757_v2 = vpop.eup %8756  ;;  %v6802_v45 = vpop.xlane.xlu1 %6801 }
 0x59c   : > { %8764 = vrcp.f32 %v6802_v45  ;;  %v7626_v22 = vsel %vm269_vm0, %v7588_v11, 0.0  ;;  %v6899_v32 = vmul.f32 %v8757_v2, %v9996_v23  ;;  %v10196_v48 = vpop.xlane.xlu0 %6789  ;;  %v7273_v11 = vrot.slane %v10054_v25, %v10167_v33 }
 0x59d   : > { %7627 = vadd.xlane.f32.xlu0 %v7626_v22 }
 0x59e   : > { %v8759_v7 = vpop.eup %8758  ;;  %v7589_v54 = vmul.f32 %v7245_v59, %v6899_v32  ;;  %v7277_v32 = vrot.slane %v10153_v41, %v10167_v33 }
 0x59f   : > { %v8761_v18 = vpop.eup %8760  ;;  %v6805_v15 = vpop.xlane.xlu1 %6804  ;;  %v6904_v26 = vmul.f32 %v8759_v7, %v10002_v10 }
 0x5a0   : > { %8766 = vrcp.f32 %v6805_v15  ;;  %v7629_v0 = vsel %vm269_vm0, %v7589_v54, 0.0  ;;  %v6900_v53 = vmul.f32 %v8761_v18, %v10004_v28  ;;  %v6793_v59 = vpop.xlane.xlu0 %6792 }
 0x5a1   : > { %7630 = vadd.xlane.f32.xlu0 %v7629_v0  ;;  %v7594_v23 = vmul.f32 %v7265_v31, %v6904_v26 }
 0x5a2   : > { %v8763_v57 = vpop.eup %8762  ;;  %v7590_v36 = vmul.f32 %v7249_v37, %v6900_v53 }
 0x5a3   : > { %v6808_v6 = vpop.xlane.xlu1 %6807  ;;  %v7644_v10 = vsel %vm269_vm0, %v7594_v23, 0.0  ;;  %v6905_v20 = vmul.f32 %v8763_v57, %v10011_v61 }
 0x5a4   : > { %8768 = vrcp.f32 %v6808_v6  ;;  %7645 = vadd.xlane.f32.xlu1 %v7644_v10  ;;  %v7632_v63 = vsel %vm269_vm0, %v7590_v36, 0.0 }
 0x5a5   : > { %7633 = vadd.xlane.f32.xlu0 %v7632_v63  ;;  %v7595_v28 = vmul.f32 %v7269_v56, %v6905_v20  ;;  %v7297_v63 = vrot.slane %v9953_v38, %v10167_v33 }
 0x5a6   : > { %v8765_v19 = vpop.eup %8764 }
 0x5a7   : > { %v6811_v2 = vpop.xlane.xlu1 %6810  ;;  %v7647_v45 = vsel %vm269_vm0, %v7595_v28, 0.0  ;;  %v6906_v30 = vmul.f32 %v8765_v19, %v10020_v13  ;;  %v7281_v13 = vrot.slane %v10159_v29, %v10167_v33 }
 0x5a8   : > { %8770 = vrcp.f32 %v6811_v2  ;;  %7648 = vadd.xlane.f32.xlu1 %v7647_v45 }
 0x5a9   : > { %v7596_v22 = vmul.f32 %v7273_v11, %v6906_v30 }
 0x5aa   : > { %v8767_v61 = vpop.eup %8766 }
 0x5ab   : > { %v10209_v7 = vpop.xlane.xlu1 %6813  ;;  %v7650_v54 = vsel %vm269_vm0, %v7596_v22, 0.0  ;;  %v6907_v18 = vmul.f32 %v8767_v61, %v10030_v9 }
 0x5ac   : > { %v6817_v25 = vpop.xlane.xlu0 %6816  ;;  %7651 = vadd.xlane.f32.xlu1 %v7650_v54 }
 0x5ad   : > { %v7597_v31 = vmul.f32 %v7277_v32, %v6907_v18 }
 0x5ae   : > { %v8769_v15 = vpop.eup %8768 }
 0x5af   : > { %v6820_v26 = vpop.xlane.xlu1 %6819  ;;  %v7653_v37 = vsel %vm269_vm0, %v7597_v31, 0.0  ;;  %v6908_v0 = vmul.f32 %v8769_v15, %v10040_v8 }
 0x5b0   : > { %8772 = vrcp.f32 %v6820_v26  ;;  %v6823_v41 = vpop.xlane.xlu0 %6822  ;;  %7654 = vadd.xlane.f32.xlu1 %v7653_v37 }
 0x5b1   : > { %v7598_v53 = vmul.f32 %v7281_v13, %v6908_v0  ;;  %8774 = vrcp.f32 %v10185_v24 }
 0x5b2   : > { %v8771_v23 = vpop.eup %8770  ;;  %8776 = vrcp.f32 %v6793_v59 }
 0x5b3   : > { %v6909_v57 = vmul.f32 %v8771_v23, %v10045_v46  ;;  %v7140_v9 = vpop.xlane.xlu1 %7139  ;;  %v7656_v36 = vsel %vm269_vm0, %v7598_v53, 0.0  ;;  %8778 = vrcp.f32 %v6817_v25  ;;  %v7261_v25 = vrot.slane %v9951_v21, %v10167_v33 }
 0x5b4   : > { %v7285_v56 = vrot.slane %v7140_v9, %v10167_v33  ;;  %v6826_v6 = vpop.xlane.xlu0 %6825  ;;  %7657 = vadd.xlane.f32.xlu1 %v7656_v36  ;;  %8780 = vrcp.f32 %v6823_v41 }
 0x5b5   : > { %8782 = vrcp.f32 %v6826_v6 }
 0x5b6   : > { %v7599_v29 = vmul.f32 %v7285_v56, %v6909_v57  ;;  %v7301_v57 = vrot.slane %v9967_v62, %v10167_v33 }
 0x5b8   : > { %v6829_v10 = vpop.xlane.xlu0 %6828  ;;  %v7659_v20 = vsel %vm269_vm0, %v7599_v29, 0.0 }
 0x5b9   : > { %7660 = vadd.xlane.f32.xlu1 %v7659_v20  ;;  %8784 = vrcp.f32 %v6829_v10 }
 0x5ba   : > { %v8773_v8 = vpop.eup %8772 }
 0x5bb   : > { %v6912_v46 = vmul.f32 %v8773_v8, %v10061_v34  ;;  %v8775_v61 = vpop.eup %8774 }
 0x5bc   : > { %v6832_v28 = vpop.xlane.xlu0 %6831  ;;  %v8777_v32 = vpop.eup %8776  ;;  %v6901_v24 = vmul.f32 %v8775_v61, %v10013_v39  ;;  %v7293_v39 = vrot.slane %v9955_v5, %v10167_v33 }
 0x5bd   : > { %v7602_v19 = vmul.f32 %v7297_v63, %v6912_v46  ;;  %v6903_v59 = vmul.f32 %v8777_v32, %v10032_v52  ;;  %v8779_v18 = vpop.eup %8778  ;;  %8786 = vrcp.f32 %v6832_v28 }
 0x5be   : > { %v6911_v37 = vmul.f32 %v8779_v18, %v10052_v51  ;;  %v8781_v0 = vpop.eup %8780  ;;  %8788 = vrcp.f32 %v10209_v7 }
 0x5bf   : > { %v6844_v11 = vpop.xlane.xlu1 %6843  ;;  %v7668_v2 = vsel %vm269_vm0, %v7602_v19, 0.0  ;;  %v7593_v26 = vmul.f32 %v7261_v25, %v6903_v59  ;;  %v6913_v21 = vmul.f32 %v8781_v0, %v10063_v1  ;;  %v8783_v23 = vpop.eup %8782  ;;  %v7305_v1 = vrot.slane %v10151_v44, %v10167_v33 }
 0x5c0   : > { %v6835_v45 = vpop.xlane.xlu0 %6834  ;;  %7669 = vadd.xlane.f32.xlu1 %v7668_v2  ;;  %v7601_v53 = vmul.f32 %v7293_v39, %v6911_v37  ;;  %8790 = vrcp.f32 %v6844_v11  ;;  %v6914_v5 = vmul.f32 %v8783_v23, %v10071_v60  ;;  %v7309_v60 = vrot.slane %v10157_v55, %v10167_v33 }
 0x5c1   : > { %v7641_v52 = vsel %vm269_vm0, %v7593_v26, 0.0  ;;  %v7603_v36 = vmul.f32 %v7301_v57, %v6913_v21  ;;  %8792 = vrcp.f32 %v6835_v45  ;;  %v10440_v26 = vld [vmem:[#allocation3_spill] sm:$0xff]  ;;  %v7337_v23 = vrot.slane %v10149_v40, %v10167_v33 }
 0x5c2   : > { %v7665_v9 = vsel %vm269_vm0, %v7601_v53, 0.0  ;;  %v7604_v29 = vmul.f32 %v7305_v1, %v6914_v5 }
 0x5c3   : > { %v6847_v30 = vpop.xlane.xlu1 %6846  ;;  %v8785_v56 = vpop.eup %8784  ;;  %v7671_v62 = vsel %vm269_vm0, %v7603_v36, 0.0 }
 0x5c4   : > { %v6841_v22 = vpop.xlane.xlu0 %6840  ;;  %8794 = vrcp.f32 %v6847_v30  ;;  %v6915_v10 = vmul.f32 %v8785_v56, %v10079_v43  ;;  %v7674_v46 = vsel %vm269_vm0, %v7604_v29, 0.0  ;;  %v7313_v43 = vrot.slane %v10165_v42, %v10167_v33  ;;  %v10441_v29 = vld [vmem:[#allocation5_spill] sm:$0xff] }
 0x5c5   : > { %8796 = vrcp.f32 %v6841_v22  ;;  %v7329_v42 = vrot.slane %v9957_v17, %v10167_v33  ;;  %v10439_v17 = vld [vmem:[#allocation4_spill] sm:$0xff] }
 0x5c6   : > { %v7605_v28 = vmul.f32 %v7309_v60, %v6915_v10 }
 0x5c7   : > { %v6850_v54 = vpop.xlane.xlu1 %6849  ;;  %v8787_v20 = vpop.eup %8786 }
 0x5c8   : > { %v7116_v38 = vpop.xlane.xlu0 %7115  ;;  %8798 = vrcp.f32 %v6850_v54  ;;  %v8789_v63 = vpop.eup %8788  ;;  %v6916_v19 = vmul.f32 %v8787_v20, %v10086_v4 }
 0x5c9   : > { %v7253_v34 = vrot.slane %v7116_v38, %v10167_v33  ;;  %8800 = vrcp.f32 %v10196_v48  ;;  %v6910_v45 = vmul.f32 %v8789_v63, %v10050_v58  ;;  %v7677_v48 = vsel %vm269_vm0, %v7605_v28, 0.0 }
 0x5ca   : > { %v8791_v44 = vpop.eup %8790  ;;  %v7606_v32 = vmul.f32 %v7313_v43, %v6916_v19 }
 0x5cb   : > { %v7591_v31 = vmul.f32 %v7253_v34, %v6901_v24  ;;  %v6853_v15 = vpop.xlane.xlu1 %6852  ;;  %v8793_v55 = vpop.eup %8792  ;;  %v6920_v22 = vmul.f32 %v8791_v44, %v10092_v12  ;;  %v10443_v44 = vld [vmem:[#allocation6_spill] sm:$0xff] }
 0x5cc   : > { %v6838_v7 = vpop.xlane.xlu0 %6837  ;;  %8802 = vrcp.f32 %v6853_v15  ;;  %v6917_v24 = vmul.f32 %v8793_v55, %v10094_v16  ;;  %v7325_v16 = vrot.slane %v10440_v26, %v10167_v33 }
 0x5cd   : > { %v7635_v13 = vsel %vm269_vm0, %v7591_v31, 0.0  ;;  %8804 = vrcp.f32 %v6838_v7  ;;  %v7610_v59 = vmul.f32 %v7329_v42, %v6920_v22  ;;  %v7680_v31 = vsel %vm269_vm0, %v7606_v32, 0.0 }
 0x5ce   : > { %7636 = vadd.xlane.f32.xlu0 %v7635_v13  ;;  %v8795_v61 = vpop.eup %8794  ;;  %v7333_v13 = vrot.slane %v10439_v17, %v10167_v33 }
 0x5cf   : > { %v6856_v41 = vpop.xlane.xlu1 %6855  ;;  %v8797_v54 = vpop.eup %8796  ;;  %v6921_v12 = vmul.f32 %v8795_v61, %v10101_v50  ;;  %v7692_v0 = vsel %vm269_vm0, %v7610_v59, 0.0 }
 0x5d0   : > { %v7164_v11 = vpop.xlane.xlu0 %7163  ;;  %8806 = vrcp.f32 %v6856_v41  ;;  %v6919_v15 = vmul.f32 %v8797_v54, %v10103_v49 }
 0x5d1   : > { %v7317_v4 = vrot.slane %v7164_v11, %v10167_v33  ;;  %v7611_v39 = vmul.f32 %v7333_v13, %v6921_v12 }
 0x5d2   : > { %7642 = vadd.xlane.f32.xlu0 %v7641_v52  ;;  %v8799_v18 = vpop.eup %8798  ;;  %v7609_v53 = vmul.f32 %v7325_v16, %v6919_v15 }
 0x5d3   : > { %v6859_v51 = vpop.xlane.xlu1 %6858  ;;  %v7607_v25 = vmul.f32 %v7317_v4, %v6917_v24  ;;  %v8801_v37 = vpop.eup %8800  ;;  %v6922_v50 = vmul.f32 %v8799_v18, %v10110_v3 }
 0x5d4   : > { %v7119_v58 = vpop.xlane.xlu0 %7118  ;;  %8808 = vrcp.f32 %v6859_v51  ;;  %v6902_v51 = vmul.f32 %v8801_v37, %v10022_v27  ;;  %v7689_v40 = vsel %vm269_vm0, %v7609_v53, 0.0 }
 0x5d5   : > { %v7257_v52 = vrot.slane %v7119_v58, %v10167_v33  ;;  %v7683_v49 = vsel %vm269_vm0, %v7607_v25, 0.0  ;;  %v7612_v3 = vmul.f32 %v7337_v23, %v6922_v50 }
 0x5d6   : > { %7666 = vadd.xlane.f32.xlu0 %v7665_v9  ;;  %v8803_v41 = vpop.eup %8802  ;;  %v7695_v9 = vsel %vm269_vm0, %v7611_v39, 0.0 }
 0x5d7   : > { %v10244_v6 = vpop.xlane.xlu1 %6861  ;;  %v8805_v21 = vpop.eup %8804  ;;  %v6923_v36 = vmul.f32 %v8803_v41, %v10117_v14  ;;  %v7592_v56 = vmul.f32 %v7257_v52, %v6902_v51  ;;  %v7698_v27 = vsel %vm269_vm0, %v7612_v3, 0.0 }
 0x5d8   : > { %v7167_v57 = vpop.xlane.xlu0 %7166  ;;  %8810 = vrcp.f32 %v10244_v6  ;;  %v6918_v1 = vmul.f32 %v8805_v21, %v10119_v47  ;;  %v10442_v47 = vld [vmem:[#allocation8_spill] sm:$0xff] }
 0x5d9   : > { %v7321_v7 = vrot.slane %v7167_v57, %v10167_v33  ;;  %v7638_v60 = vsel %vm269_vm0, %v7592_v56, 0.0  ;;  %v7345_v63 = vrot.slane %v10442_v47, %v10167_v33 }
 0x5da   : > { %7672 = vadd.xlane.f32.xlu0 %v7671_v62  ;;  %v8807_v5 = vpop.eup %8806  ;;  %v7341_v62 = vrot.slane %v10155_v35, %v10167_v33 }
 0x5db   : > { %v10250_v8 = vpop.xlane.xlu1 %7187  ;;  %v6924_v10 = vmul.f32 %v8807_v5, %v10441_v29  ;;  %v7608_v14 = vmul.f32 %v7321_v7, %v6918_v1 }
 0x5dc   : > { %v7613_v6 = vmul.f32 %v7341_v62, %v6923_v36 }
 0x5dd   : > { %v7614_v35 = vmul.f32 %v7345_v63, %v6924_v10  ;;  %v7686_v43 = vsel %vm269_vm0, %v7608_v14, 0.0 }
 0x5de   : > { %7675 = vadd.xlane.f32.xlu0 %v7674_v46  ;;  %v8809_v20 = vpop.eup %8808  ;;  %v7701_v28 = vsel %vm269_vm0, %v7613_v6, 0.0 }
 0x5df   : > { %v7143_v2 = vpop.xlane.xlu1 %7142  ;;  %v6925_v46 = vmul.f32 %v8809_v20, %v10443_v44  ;;  %v7704_v61 = vsel %vm269_vm0, %v7614_v35, 0.0 }
 0x5e0   : > { %v7289_v30 = vrot.slane %v7143_v2, %v10167_v33  ;;  %v7349_v2 = vrot.slane %v10250_v8, %v10167_v33 }
 0x5e2   : > { %v7600_v38 = vmul.f32 %v7289_v30, %v6910_v45  ;;  %7678 = vadd.xlane.f32.xlu0 %v7677_v48  ;;  %v8811_v19 = vpop.eup %8810  ;;  %v7615_v55 = vmul.f32 %v7349_v2, %v6925_v46  ;;  %v10444_v45 = vld [vmem:[#allocation7_spill] sm:$0xff] }
 0x5e3   : > { %v7191_v11 = vpop.xlane.xlu1 %7190  ;;  %v6926_v30 = vmul.f32 %v8811_v19, %v10444_v45 }
 0x5e4   : > { %v7662_v34 = vsel %vm269_vm0, %v7600_v38, 0.0  ;;  %v7353_v22 = vrot.slane %v7191_v11, %v10167_v33  ;;  %v7707_v48 = vsel %vm269_vm0, %v7615_v55, 0.0 }
 0x5e5   : > { %7663 = vadd.xlane.f32.xlu1 %v7662_v34 }
 0x5e6   : > { %7681 = vadd.xlane.f32.xlu0 %v7680_v31  ;;  %v7616_v4 = vmul.f32 %v7353_v22, %v6926_v30  ;;  %v10303_v31 = vstv %s7713_s10 }
 0x5e8   : > { %v7710_v32 = vsel %vm269_vm0, %v7616_v4, 0.0 }
 0x5e9   : > { %7693 = vadd.xlane.f32.xlu1 %v7692_v0 }
 0x5ea   : > { %7684 = vadd.xlane.f32.xlu0 %v7683_v49 }
 0x5ed   : > { %7696 = vadd.xlane.f32.xlu1 %v7695_v9 }
 0x5ee   : > { %7690 = vadd.xlane.f32.xlu0 %v7689_v40 }
 0x5f1   : > { %7699 = vadd.xlane.f32.xlu1 %v7698_v27 }
 0x5f2   : > { %7639 = vadd.xlane.f32.xlu0 %v7638_v60 }
 0x5f5   : > { %7702 = vadd.xlane.f32.xlu1 %v7701_v28 }
 0x5f6   : > { %7687 = vadd.xlane.f32.xlu0 %v7686_v43 }
 0x5f9   : > { %7705 = vadd.xlane.f32.xlu1 %v7704_v61 }
 0x5fd   : > { %7708 = vadd.xlane.f32.xlu1 %v7707_v48 }
 0x601   : > { %7711 = vadd.xlane.f32.xlu1 %v7710_v32 }
 0x621   : > { %v7619_v54 = vpop.xlane.xlu0 %7618 }
 0x622   : > { %v7622_v38 = vpop.xlane.xlu1 %7621  ;;  %v7715_v60 = vadd.f32 %v10303_v31, %v7619_v54 }
 0x623   : > { %v7716_v14 = vadd.f32 %v10303_v31, %v7622_v38 }
 0x624   : > { %v7782_v43 = vrot.slane %v7715_v60, %v10167_v33 }
 0x625   : > { %v7786_v11 = vrot.slane %v7716_v14, %v10167_v33 }
 0x626   : > { %v7625_v42 = vpop.xlane.xlu0 %7624 }
 0x627   : > { %v7717_v44 = vadd.f32 %v10303_v31, %v7625_v42 }
 0x629   : > { %v7790_v30 = vrot.slane %v7717_v44, %v10167_v33 }
 0x62a   : > { %v7628_v8 = vpop.xlane.xlu0 %7627 }
 0x62b   : > { %v7718_v35 = vadd.f32 %v10303_v31, %v7628_v8  ;;  %v7907_v8 = vsel %vm7354_vm2, %v7786_v11, %v7782_v43 }
 0x62d   : > { %v7794_v48 = vrot.slane %v7718_v35, %v10167_v33 }
 0x62e   : > { %v7631_v58 = vpop.xlane.xlu0 %7630 }
 0x62f   : > { %v7719_v19 = vadd.f32 %v10303_v31, %v7631_v58 }
 0x631   : > { %v7646_v24 = vpop.xlane.xlu1 %7645  ;;  %v7798_v42 = vrot.slane %v7719_v19, %v10167_v33 }
 0x632   : > { %v7634_v59 = vpop.xlane.xlu0 %7633  ;;  %v7724_v13 = vadd.f32 %v10303_v31, %v7646_v24 }
 0x633   : > { %v7720_v2 = vadd.f32 %v10303_v31, %v7634_v59 }
 0x634   : > { %v7818_v39 = vrot.slane %v7724_v13, %v10167_v33 }
 0x635   : > { %v7649_v34 = vpop.xlane.xlu1 %7648  ;;  %v7802_v24 = vrot.slane %v7720_v2, %v10167_v33 }
 0x636   : > { %v7725_v37 = vadd.f32 %v10303_v31, %v7649_v34 }
 0x638   : > { %v7822_v49 = vrot.slane %v7725_v37, %v10167_v33 }
 0x639   : > { %v7652_v12 = vpop.xlane.xlu1 %7651 }
 0x63a   : > { %v7726_v50 = vadd.f32 %v10303_v31, %v7652_v12  ;;  %v7908_v12 = vsel %vm7355_vm3, %v7790_v30, %v7907_v8 }
 0x63b   : > { %v7909_v13 = vsel %vm7357_vm4, %v7794_v48, %v7908_v12 }
 0x63c   : > { %v7826_v57 = vrot.slane %v7726_v50, %v10167_v33 }
 0x63d   : > { %v7655_v25 = vpop.xlane.xlu1 %7654 }
 0x63e   : > { %v7727_v53 = vadd.f32 %v10303_v31, %v7655_v25 }
 0x640   : > { %v7830_v36 = vrot.slane %v7727_v53, %v10167_v33 }
 0x641   : > { %v7658_v0 = vpop.xlane.xlu1 %7657 }
 0x642   : > { %v7728_v9 = vadd.f32 %v10303_v31, %v7658_v0  ;;  %v7910_v0 = vsel %vm7359_vm5, %v7798_v42, %v7909_v13 }
 0x643   : > { %v7911_v50 = vsel %vm7361_vm6, %v7802_v24, %v7910_v0 }
 0x644   : > { %v7834_v40 = vrot.slane %v7728_v9, %v10167_v33 }
 0x646   : > { %v7661_v21 = vpop.xlane.xlu1 %7660 }
 0x647   : > { %v7729_v1 = vadd.f32 %v10303_v31, %v7661_v21 }
 0x649   : > { %v7838_v10 = vrot.slane %v7729_v1, %v10167_v33 }
 0x64d   : > { %v7670_v5 = vpop.xlane.xlu1 %7669 }
 0x64e   : > { %v7732_v32 = vadd.f32 %v10303_v31, %v7670_v5 }
 0x65b   : > { %v7637_v18 = vpop.xlane.xlu0 %7636 }
 0x65c   : > { %v7721_v22 = vadd.f32 %v10303_v31, %v7637_v18 }
 0x65e   : > { %v7806_v18 = vrot.slane %v7721_v22, %v10167_v33 }
 0x65f   : > { %v7643_v15 = vpop.xlane.xlu0 %7642 }
 0x660   : > { %v7723_v17 = vadd.f32 %v10303_v31, %v7643_v15  ;;  %v7912_v21 = vsel %vm7363_vm8, %v7806_v18, %v7911_v50 }
 0x662   : > { %v7814_v26 = vrot.slane %v7723_v17, %v10167_v33 }
 0x663   : > { %v7667_v16 = vpop.xlane.xlu0 %7666 }
 0x664   : > { %v7914_v41 = vsel %vm7354_vm2, %v7818_v39, %v7814_v26  ;;  %v7731_v55 = vadd.f32 %v10303_v31, %v7667_v16  ;;  %v7850_v26 = vrot.slane %v7732_v32, %v10167_v33 }
 0x665   : > { %v7915_v23 = vsel %vm7355_vm3, %v7822_v49, %v7914_v41 }
 0x666   : > { %v7916_v3 = vsel %vm7357_vm4, %v7826_v57, %v7915_v23  ;;  %v7846_v58 = vrot.slane %v7731_v55, %v10167_v33 }
 0x667   : > { %v7673_v52 = vpop.xlane.xlu0 %7672  ;;  %v7917_v7 = vsel %vm7359_vm5, %v7830_v36, %v7916_v3 }
 0x668   : > { %v7918_v6 = vsel %vm7361_vm6, %v7834_v40, %v7917_v7  ;;  %v7733_v61 = vadd.f32 %v10303_v31, %v7673_v52  ;;  %v7921_v41 = vsel %vm7354_vm2, %v7850_v26, %v7846_v58 }
 0x669   : > { %v7919_v47 = vsel %vm7363_vm8, %v7838_v10, %v7918_v6 }
 0x66a   : > { %v7854_v25 = vrot.slane %v7733_v61, %v10167_v33 }
 0x66b   : > { %v7676_v51 = vpop.xlane.xlu0 %7675 }
 0x66c   : > { %v7734_v54 = vadd.f32 %v10303_v31, %v7676_v51  ;;  %v7922_v23 = vsel %vm7355_vm3, %v7854_v25, %v7921_v41 }
 0x66e   : > { %v7858_v16 = vrot.slane %v7734_v54, %v10167_v33 }
 0x66f   : > { %v7679_v56 = vpop.xlane.xlu0 %7678 }
 0x670   : > { %v7735_v38 = vadd.f32 %v10303_v31, %v7679_v56  ;;  %v7923_v3 = vsel %vm7357_vm4, %v7858_v16, %v7922_v23 }
 0x672   : > { %v7664_v62 = vpop.xlane.xlu1 %7663  ;;  %v7862_v39 = vrot.slane %v7735_v38, %v10167_v33 }
 0x673   : > { %v7730_v27 = vadd.f32 %v10303_v31, %v7664_v62  ;;  %v7682_v29 = vpop.xlane.xlu0 %7681 }
 0x674   : > { %v7736_v34 = vadd.f32 %v10303_v31, %v7682_v29  ;;  %v7924_v56 = vsel %vm7359_vm5, %v7862_v39, %v7923_v3 }
 0x675   : > { %v7842_v20 = vrot.slane %v7730_v27, %v10167_v33 }
 0x676   : > { %v7694_v63 = vpop.xlane.xlu1 %7693  ;;  %v7866_v52 = vrot.slane %v7736_v34, %v10167_v33 }
 0x677   : > { %v7920_v46 = vsel %vm7365_vm7, %v7842_v20, %v7919_v47  ;;  %v7685_v28 = vpop.xlane.xlu0 %7684  ;;  %v7740_v1 = vadd.f32 %v10303_v31, %v7694_v63 }
 0x678   : > { %7940 = vst.msk [vmem:[%s10330_s15 + $0x8] sm:$0xff] %vm269_vm0, %v7920_v46  ;;  %v7737_v15 = vadd.f32 %v10303_v31, %v7685_v28  ;;  %v7925_v7 = vsel %vm7361_vm6, %v7866_v52, %v7924_v56 }
 0x679   : > { %v7882_v60 = vrot.slane %v7740_v1, %v10167_v33 }
 0x67a   : > { %v7697_v45 = vpop.xlane.xlu1 %7696  ;;  %v7870_v57 = vrot.slane %v7737_v15, %v10167_v33 }
 0x67b   : > { %v7691_v4 = vpop.xlane.xlu0 %7690  ;;  %v7741_v40 = vadd.f32 %v10303_v31, %v7697_v45 }
 0x67c   : > { %v7739_v51 = vadd.f32 %v10303_v31, %v7691_v4  ;;  %v7926_v6 = vsel %vm7363_vm8, %v7870_v57, %v7925_v7 }
 0x67d   : > { %v7886_v63 = vrot.slane %v7741_v40, %v10167_v33 }
 0x67e   : > { %v7700_v59 = vpop.xlane.xlu1 %7699  ;;  %v7878_v29 = vrot.slane %v7739_v51, %v10167_v33 }
 0x67f   : > { %v7640_v17 = vpop.xlane.xlu0 %7639  ;;  %v7742_v10 = vadd.f32 %v10303_v31, %v7700_v59 }
 0x680   : > { %v7722_v37 = vadd.f32 %v10303_v31, %v7640_v17  ;;  %v7928_v46 = vsel %vm7354_vm2, %v7882_v60, %v7878_v29 }
 0x681   : > { %v7890_v28 = vrot.slane %v7742_v10, %v10167_v33  ;;  %v7929_v43 = vsel %vm7355_vm3, %v7886_v63, %v7928_v46 }
 0x682   : > { %v7810_v49 = vrot.slane %v7722_v37, %v10167_v33  ;;  %v7703_v53 = vpop.xlane.xlu1 %7702 }
 0x683   : > { %v7688_v9 = vpop.xlane.xlu0 %7687  ;;  %v7743_v20 = vadd.f32 %v10303_v31, %v7703_v53  ;;  %v7930_v45 = vsel %vm7357_vm4, %v7890_v28, %v7929_v43 }
 0x684   : > { %v7913_v36 = vsel %vm7365_vm7, %v7810_v49, %v7912_v21  ;;  %v7738_v5 = vadd.f32 %v10303_v31, %v7688_v9 }
 0x685   : > { %7939 = vst.msk [vmem:[%s10330_s15] sm:$0xff] %vm269_vm0, %v7913_v36  ;;  %v7894_v19 = vrot.slane %v7743_v20, %v10167_v33 }
 0x686   : > { %v7874_v62 = vrot.slane %v7738_v5, %v10167_v33  ;;  %v7706_v27 = vpop.xlane.xlu1 %7705 }
 0x687   : > { %v7744_v47 = vadd.f32 %v10303_v31, %v7706_v27  ;;  %v7931_v22 = vsel %vm7359_vm5, %v7894_v19, %v7930_v45 }
 0x688   : > { %v7927_v14 = vsel %vm7365_vm7, %v7874_v62, %v7926_v6 }
 0x689   : > { %7941 = vst.msk [vmem:[%s10330_s15 + $0x10] sm:$0xff] %vm269_vm0, %v7927_v14  ;;  %v7898_v11 = vrot.slane %v7744_v47, %v10167_v33 }
 0x68a   : > { %v7709_v44 = vpop.xlane.xlu1 %7708 }
 0x68b   : > { %v7745_v35 = vadd.f32 %v10303_v31, %v7709_v44  ;;  %v7932_v61 = vsel %vm7361_vm6, %v7898_v11, %v7931_v22 }
 0x68d   : > { %v7902_v2 = vrot.slane %v7745_v35, %v10167_v33 }
 0x68e   : > { %v7712_v55 = vpop.xlane.xlu1 %7711 }
 0x68f   : > { %v7746_v30 = vadd.f32 %v10303_v31, %v7712_v55  ;;  %v7933_v48 = vsel %vm7363_vm8, %v7902_v2, %v7932_v61 }
 0x691   : > { %v7906_v4 = vrot.slane %v7746_v30, %v10167_v33 }
 0x693   : > { %v7934_v32 = vsel %vm7365_vm7, %v7906_v4, %v7933_v48 }
 0x694   : > { %7942 = vst.msk [vmem:[%s10330_s15 + $0x18] sm:$0xff] %vm269_vm0, %v7934_v32 }
 0x695 PF: > { %s16_s20 = sadd.s32 1, %s8818_s20  }
 0x696   : > { %p13_p5 = scmp.ge.s32.totalorder %s16_s20, 6  }
 0x698   :  { %15 = sbr.rel (!%p13_p5) target bundleno = 2 (0x2), region = 70 }

</bundles_post_ra>
